<compile_context>
chip_gen: v6e
topology: v6e:2x2x1
jax: 0.10.0
libtpu: 0.0.40
codegen_flags: <defaults>
</compile_context>

<pallas_src>
import jax
import jax.numpy as jnp
from jax.experimental import pallas as pl
from jax.experimental.pallas import tpu as pltpu


def _round_up(x, m):
    return ((x + m - 1) // m) * m


def _cdiv(a, b):
    return -(-a // b)


def _make_kernel(precision):
    """Row-tile kernel. All heavy / grid-invariant constants arrive as inputs."""

    def kernel(x_ref, w_ref, g_ref, gt_ref, st_ref, out_ref):
        # embeddings for this row tile: (tn, OUT_pad); padded columns are exact 0.
        emb = jnp.dot(x_ref[...], w_ref[...],
                      preferred_element_type=jnp.float32, precision=precision)

        # per-cluster squared norms via MXU segment-sum: (tn, K)
        normsq = jnp.dot(emb * emb, g_ref[...],
                         preferred_element_type=jnp.float32, precision=precision)

        norm = jnp.sqrt(normsq)                       # exact; 0 for zero-norm cluster
        # Guarded inverse norm: zero-norm cluster -> 0 (keeps inf out of the MXU;
        # rho below matches the reference exactly, mu is 0 instead of NaN there).
        inv = jnp.where(normsq > 0.0, jax.lax.rsqrt(normsq), 0.0)
        rho = norm / (norm + 1.0)                     # (tn, K); 0/(0+1)=0 ✓

        # broadcast inv back to the K*d lanes, and scatter rho into its spare lanes,
        # both with tiny MXU matmuls (MXU is otherwise idle here).
        inv_full = jnp.dot(inv, gt_ref[...],
                           preferred_element_type=jnp.float32, precision=precision)
        rho_full = jnp.dot(rho, st_ref[...],
                           preferred_element_type=jnp.float32, precision=precision)

        # single lane-dense store: mu in [0,KD), rho in [KD,KD+K), zeros after.
        out_ref[...] = (emb * inv_full + rho_full).astype(out_ref.dtype)

    return kernel


def spherical_clustering_forward(x, w, num_clusters, response_dim,
                                 tile_n=None, compute_dtype=jnp.float32,
                                 out_dtype=jnp.float32):
    """x: (N, C) f32, w: (C, K*d) (pre-transposed nn.Linear weight).

    Returns mu (N, K, d) and rho (N, K, 1), matching the PyTorch forward with the
    all-True cluster mask (see header for the zero-norm edge case).
    """
    N, C = x.shape
    K, d = num_clusters, response_dim
    KD = K * d
    assert w.shape == (C, KD)

    # --- packed, lane-dense output layout: [mu (KD) | rho (K) | zeros] per row.
    OUT_pad = _round_up(KD + K, 128)
    # TODO(synk): for KD+K << 128 with very large N, benchmark this padded dense
    # store against an unpadded masked store (extra HBM writeback can dominate).

    # --- optional contraction-dim padding for MXU alignment (skip for tiny C).
    C_pad = _round_up(C, 128) if (C >= 128 and C % 128 != 0) else C
    # TODO(synk): pad C to a multiple of 256 on v6e/v7x when C is large.

    in_dtype = jnp.dtype(compute_dtype)
    out_dtype = jnp.dtype(out_dtype)
    x_in = x.astype(in_dtype)          # cast in the wrapper (halves DMA bytes for bf16)
    w_in = w.astype(in_dtype)
    if C_pad != C:
        x_in = jnp.pad(x_in, ((0, 0), (0, C_pad - C)))
        w_in = jnp.pad(w_in, ((0, C_pad - C), (0, 0)))
    if OUT_pad != KD:
        w_in = jnp.pad(w_in, ((0, 0), (0, OUT_pad - KD)))

    # --- grid-invariant constant matrices (built once, outside the kernel):
    #   g  (OUT_pad, K): g[j,k] = 1 iff flat column j belongs to cluster k
    #   g_t (K, OUT_pad): transpose of g (broadcast per-cluster scale back to d lanes)
    #   s_t (K, OUT_pad): s_t[k, KD+k] = 1 (scatter rho into the spare lanes)
    jcol = jnp.arange(OUT_pad, dtype=jnp.int32)[:, None]
    kcol = jnp.arange(K, dtype=jnp.int32)[None, :]
    g = ((jcol >= kcol * d) & (jcol < (kcol + 1) * d)).astype(jnp.float32)
    g_t = g.T
    s_t = (jnp.arange(OUT_pad, dtype=jnp.int32)[None, :] ==
           (KD + jnp.arange(K, dtype=jnp.int32))[:, None]).astype(jnp.float32)

    # --- tile_n / vmem budget from the actual generation's VMEM capacity.
    try:
        vmem_cap = int(pltpu.get_tpu_info().vmem_capacity_bytes)
    except Exception:
        vmem_cap = 64 << 20                       # conservative (v7x per-core)
    budget = int(vmem_cap * 0.70)                 # headroom for Mosaic internal scratch

    in_bytes = in_dtype.itemsize
    out_bytes = out_dtype.itemsize
    # Constants (assume worst case of 2 buffers in case Buffered(1) is unavailable).
    const_bytes = 2 * (C_pad * OUT_pad * in_bytes + 3 * K * OUT_pad * 4)
    # Per-row footprint: x tile (x2 buffers) + packed out tile (x2 buffers)
    # + in-kernel f32 temporaries (emb, emb*emb, inv_full, rho_full, result).
    per_row = (2 * C_pad * in_bytes + 2 * OUT_pad * out_bytes + 5 * OUT_pad * 4)
    rows_fit = max(8, (budget - const_bytes) // per_row)
    tile_max = max(8, (rows_fit // 8) * 8)
    # TODO(synk): once C_pad*OUT_pad*in_bytes approaches ~25% of `budget` (half the
    # threshold on v7x), add an inner "arbitrary" C-reduction grid axis with an f32
    # accumulator scratch instead of holding all of W resident.

    N8 = _round_up(N, 8)
    tile = tile_max if tile_n is None else _round_up(max(8, int(tile_n)), 8)
    tile = min(tile, tile_max, N8)
    if N8 >= 16:
        # >= 2 grid steps so v7x's two TensorCores both get work on the parallel
        # axis; costs one ~0.35us grid step on single-TC chips.
        tile = min(tile, _round_up(_cdiv(N8, 2), 8))
    tile = max(8, (tile // 8) * 8)

    N_pad = _round_up(N, tile)
    if N_pad != N:
        x_in = jnp.pad(x_in, ((0, N_pad - N), (0, 0)))
    grid = (N_pad // tile,)

    vmem_limit = int(min(max(const_bytes + tile * per_row + (4 << 20), 16 << 20),
                         int(vmem_cap * 0.85)))

    precision = jax.lax.Precision.HIGHEST if in_dtype == jnp.float32 else None
    kernel = _make_kernel(precision)

    def _call(single_buffer_consts):
        def const_spec(shape):
            if single_buffer_consts:
                return pl.BlockSpec(shape, lambda i: (0, 0),
                                    pipeline_mode=pl.Buffered(1))
            return pl.BlockSpec(shape, lambda i: (0, 0))

        return pl.pallas_call(
            kernel,
            out_shape=jax.ShapeDtypeStruct((N_pad, OUT_pad), out_dtype),
            grid_spec=pltpu.PrefetchScalarGridSpec(
                num_scalar_prefetch=0,
                grid=grid,
                in_specs=[
                    pl.BlockSpec((tile, C_pad), lambda i: (i, 0)),   # X row tile
                    const_spec((C_pad, OUT_pad)),                    # W (grid-invariant)
                    const_spec((OUT_pad, K)),                        # g
                    const_spec((K, OUT_pad)),                        # g^T
                    const_spec((K, OUT_pad)),                        # rho scatter
                ],
                out_specs=pl.BlockSpec((tile, OUT_pad), lambda i: (i, 0)),
            ),
            compiler_params=pltpu.CompilerParams(
                dimension_semantics=("parallel",),
                vmem_limit_bytes=vmem_limit,
            ),
        )(x_in, w_in, g, g_t, s_t)

    try:
        packed = _call(True)
    except Exception:
        # pl.Buffered(1) not supported by this JAX build -> default double-buffering.
        packed = _call(False)

    packed = packed[:N]
    mu = packed[:, :KD].reshape(N, K, d)
    rho = packed[:, KD:KD + K].reshape(N, K, 1)
    return mu, rho


if __name__ == "__main__":
    # Small shapes consistent with the module's forward.
    N = 16                 # batch of covariate rows
    num_covariates = 8     # C
    response_dim = 8       # d
    num_clusters = 4       # K

    key = jax.random.PRNGKey(0)
    kx, kw = jax.random.split(key)

    x = jax.random.normal(kx, (N, num_covariates), dtype=jnp.float32)

    # Deterministic init of nn.Linear(num_covariates, d*K, bias=False) weight
    # (PyTorch shape (d*K, C)); stored transposed as (C, d*K).
    bound = 1.0 / (num_covariates ** 0.5)
    w_pt = jax.random.uniform(
        kw, (response_dim * num_clusters, num_covariates),
        minval=-bound, maxval=bound, dtype=jnp.float32)
    w = w_pt.T  # (C, K*d)

    # Pure-JAX reference (mirrors the PyTorch forward with the all-True mask).
    emb_ref = jnp.dot(x, w, precision=jax.lax.Precision.HIGHEST)
    emb_ref = emb_ref.reshape(N, num_clusters, response_dim)
    norm_ref = jnp.linalg.norm(emb_ref, axis=-1, keepdims=True)
    mu_ref = emb_ref / norm_ref
    rho_ref = norm_ref / (norm_ref + 1.0)

    # --- f32 compute path ---------------------------------------------------
    mu, rho = spherical_clustering_forward(x, w, num_clusters, response_dim)
    mu, rho = jax.block_until_ready((mu, rho))
    assert mu.shape == (N, num_clusters, response_dim)
    assert rho.shape == (N, num_clusters, 1)
    # Tolerance leaves margin for MXU matmul-precision differences while still
    # catching any packing / normalization / rho-lane bugs (those would be O(1)).
    assert jnp.allclose(mu, mu_ref, atol=1e-2, rtol=1e-2)
    assert jnp.allclose(rho, rho_ref, atol=1e-2, rtol=1e-2)

    # --- bf16 MXU-input path (v6e/v7x throughput mode; loose check) ----------
    mu_b, rho_b = spherical_clustering_forward(
        x, w, num_clusters, response_dim, compute_dtype=jnp.bfloat16)
    mu_b, rho_b = jax.block_until_ready((mu_b, rho_b))
    assert jnp.allclose(mu_b, mu_ref, atol=5e-2, rtol=5e-2)
    assert jnp.allclose(rho_b, rho_ref, atol=5e-2, rtol=5e-2)

    # TODO(synk): E_step / M_step / fit / predict_and_cluster (AdamW optimizer,
    # dynamic cluster pruning with data-dependent shapes, plotting) are host-side
    # training-loop logic and are not translated to kernels.
    print("KERNEL_OK")
</pallas_src>

<mosaic_0001>
module attributes {stable_mosaic.version = 11 : i64} {
  func.func @kernel(%arg0: i32, %arg1: memref<8x8xf32, #tpu.memory_space<vmem>>, %arg2: memref<8x128xf32, #tpu.memory_space<vmem>>, %arg3: memref<128x4xf32, #tpu.memory_space<vmem>>, %arg4: memref<4x128xf32, #tpu.memory_space<vmem>>, %arg5: memref<4x128xf32, #tpu.memory_space<vmem>>, %arg6: memref<8x128xf32, #tpu.memory_space<vmem>>) attributes {dimension_semantics = [#tpu.dimension_semantics<parallel>], iteration_bounds = array<i64: 2>, scalar_prefetch = 0 : i64, scratch_operands = 0 : i64, tpu.core_type = #tpu.core_type<tc>, window_params = [{transform_indices = @transform_0, window_bounds = array<i64: 8, 8>}, {pipeline_mode = #tpu.pipeline_mode<synchronous>, transform_indices = @transform_1, window_bounds = array<i64: 8, 128>}, {pipeline_mode = #tpu.pipeline_mode<synchronous>, transform_indices = @transform_2, window_bounds = array<i64: 128, 4>}, {pipeline_mode = #tpu.pipeline_mode<synchronous>, transform_indices = @transform_3, window_bounds = array<i64: 4, 128>}, {pipeline_mode = #tpu.pipeline_mode<synchronous>, transform_indices = @transform_4, window_bounds = array<i64: 4, 128>}, {transform_indices = @transform_5, window_bounds = array<i64: 8, 128>}]} {
    %c0 = arith.constant 0 : index
    %c0_0 = arith.constant 0 : index
    %0 = vector.load %arg1[%c0, %c0_0] : memref<8x8xf32, #tpu.memory_space<vmem>>, vector<8x8xf32>
    %c0_1 = arith.constant 0 : index
    %c0_2 = arith.constant 0 : index
    %1 = vector.load %arg2[%c0_1, %c0_2] : memref<8x128xf32, #tpu.memory_space<vmem>>, vector<8x128xf32>
    %cst = arith.constant dense<0.000000e+00> : vector<8x128xf32>
    %2 = tpu.matmul %0, %1, %cst {dimension_numbers = #tpu.dot_dimension_numbers<[1], [0], [0], [1], [0, 0, 1, 1], [], []>, precision = #tpu.contract_precision<fp32>} : vector<8x8xf32>, vector<8x128xf32>, vector<8x128xf32> -> vector<8x128xf32>
    %3 = arith.mulf %2, %2 : vector<8x128xf32>
    %c0_3 = arith.constant 0 : index
    %c0_4 = arith.constant 0 : index
    %4 = vector.load %arg3[%c0_3, %c0_4] : memref<128x4xf32, #tpu.memory_space<vmem>>, vector<128x4xf32>
    %cst_5 = arith.constant dense<0.000000e+00> : vector<8x4xf32>
    %5 = tpu.matmul %3, %4, %cst_5 {dimension_numbers = #tpu.dot_dimension_numbers<[1], [0], [0], [1], [0, 0, 1, 1], [], []>, precision = #tpu.contract_precision<fp32>} : vector<8x128xf32>, vector<128x4xf32>, vector<8x4xf32> -> vector<8x4xf32>
    %6 = math.sqrt %5 : vector<8x4xf32>
    %cst_6 = arith.constant 0.000000e+00 : f32
    %7 = vector.broadcast %cst_6 : f32 to vector<8x4xf32>
    %8 = arith.cmpf ogt, %5, %7 : vector<8x4xf32>
    %9 = math.rsqrt %5 : vector<8x4xf32>
    %cst_7 = arith.constant 0.000000e+00 : f32
    %10 = vector.broadcast %cst_7 : f32 to vector<8x4xf32>
    %11 = arith.select %8, %9, %10 : vector<8x4xi1>, vector<8x4xf32>
    %cst_8 = arith.constant 1.000000e+00 : f32
    %12 = vector.broadcast %cst_8 : f32 to vector<8x4xf32>
    %13 = arith.addf %6, %12 : vector<8x4xf32>
    %14 = arith.divf %6, %13 : vector<8x4xf32>
    %c0_9 = arith.constant 0 : index
    %c0_10 = arith.constant 0 : index
    %15 = vector.load %arg4[%c0_9, %c0_10] : memref<4x128xf32, #tpu.memory_space<vmem>>, vector<4x128xf32>
    %cst_11 = arith.constant dense<0.000000e+00> : vector<8x128xf32>
    %16 = tpu.matmul %11, %15, %cst_11 {dimension_numbers = #tpu.dot_dimension_numbers<[1], [0], [0], [1], [0, 0, 1, 1], [], []>, precision = #tpu.contract_precision<fp32>} : vector<8x4xf32>, vector<4x128xf32>, vector<8x128xf32> -> vector<8x128xf32>
    %c0_12 = arith.constant 0 : index
    %c0_13 = arith.constant 0 : index
    %17 = vector.load %arg5[%c0_12, %c0_13] : memref<4x128xf32, #tpu.memory_space<vmem>>, vector<4x128xf32>
    %cst_14 = arith.constant dense<0.000000e+00> : vector<8x128xf32>
    %18 = tpu.matmul %14, %17, %cst_14 {dimension_numbers = #tpu.dot_dimension_numbers<[1], [0], [0], [1], [0, 0, 1, 1], [], []>, precision = #tpu.contract_precision<fp32>} : vector<8x4xf32>, vector<4x128xf32>, vector<8x128xf32> -> vector<8x128xf32>
    %19 = arith.mulf %2, %16 : vector<8x128xf32>
    %20 = arith.addf %19, %18 : vector<8x128xf32>
    %c0_15 = arith.constant 0 : index
    %c0_16 = arith.constant 0 : index
    %21 = vector.load %arg6[%c0_15, %c0_16] : memref<8x128xf32, #tpu.memory_space<vmem>>, vector<8x128xf32>
    tpu.vector_store %arg6[%c0_15, %c0_16], %20 {strides = array<i32>} : memref<8x128xf32, #tpu.memory_space<vmem>>, vector<8x128xf32>,
    return
  }
  func.func @transform_0(%arg0: i32) -> (i32, i32) {
    %c0_i32 = arith.constant 0 : i32
    %c0_i32_0 = arith.constant 0 : i32
    return %arg0, %c0_i32 : i32, i32
  }
  func.func @transform_1(%arg0: i32) -> (i32, i32) {
    %c0_i32 = arith.constant 0 : i32
    %c0_i32_0 = arith.constant 0 : i32
    %c0_i32_1 = arith.constant 0 : i32
    return %c0_i32, %c0_i32_0 : i32, i32
  }
  func.func @transform_2(%arg0: i32) -> (i32, i32) {
    %c0_i32 = arith.constant 0 : i32
    %c0_i32_0 = arith.constant 0 : i32
    %c0_i32_1 = arith.constant 0 : i32
    return %c0_i32, %c0_i32_0 : i32, i32
  }
  func.func @transform_3(%arg0: i32) -> (i32, i32) {
    %c0_i32 = arith.constant 0 : i32
    %c0_i32_0 = arith.constant 0 : i32
    %c0_i32_1 = arith.constant 0 : i32
    return %c0_i32, %c0_i32_0 : i32, i32
  }
  func.func @transform_4(%arg0: i32) -> (i32, i32) {
    %c0_i32 = arith.constant 0 : i32
    %c0_i32_0 = arith.constant 0 : i32
    %c0_i32_1 = arith.constant 0 : i32
    return %c0_i32, %c0_i32_0 : i32, i32
  }
  func.func @transform_5(%arg0: i32) -> (i32, i32) {
    %c0_i32 = arith.constant 0 : i32
    %c0_i32_0 = arith.constant 0 : i32
    return %arg0, %c0_i32 : i32, i32
  }
}

module attributes {stable_mosaic.version = 11 : i64} {
  func.func @kernel(%arg0: i32, %arg1: memref<8x8xf32, #tpu.memory_space<vmem>>, %arg2: memref<8x128xf32, #tpu.memory_space<vmem>>, %arg3: memref<128x4xf32, #tpu.memory_space<vmem>>, %arg4: memref<4x128xf32, #tpu.memory_space<vmem>>, %arg5: memref<4x128xf32, #tpu.memory_space<vmem>>, %arg6: memref<8x128xf32, #tpu.memory_space<vmem>>) attributes {dimension_semantics = [#tpu.dimension_semantics<parallel>], iteration_bounds = array<i64: 2>, scalar_prefetch = 0 : i64, scratch_operands = 0 : i64, tpu.core_type = #tpu.core_type<tc>, window_params = [{transform_indices = @transform_0, window_bounds = array<i64: 8, 8>}, {pipeline_mode = #tpu.pipeline_mode<synchronous>, transform_indices = @transform_1, window_bounds = array<i64: 8, 128>}, {pipeline_mode = #tpu.pipeline_mode<synchronous>, transform_indices = @transform_2, window_bounds = array<i64: 128, 4>}, {pipeline_mode = #tpu.pipeline_mode<synchronous>, transform_indices = @transform_3, window_bounds = array<i64: 4, 128>}, {pipeline_mode = #tpu.pipeline_mode<synchronous>, transform_indices = @transform_4, window_bounds = array<i64: 4, 128>}, {transform_indices = @transform_5, window_bounds = array<i64: 8, 128>}]} {
    %c0 = arith.constant 0 : index
    %c0_0 = arith.constant 0 : index
    %0 = vector.load %arg1[%c0, %c0_0] : memref<8x8xf32, #tpu.memory_space<vmem>>, vector<8x8xf32>
    %c0_1 = arith.constant 0 : index
    %c0_2 = arith.constant 0 : index
    %1 = vector.load %arg2[%c0_1, %c0_2] : memref<8x128xf32, #tpu.memory_space<vmem>>, vector<8x128xf32>
    %cst = arith.constant dense<0.000000e+00> : vector<8x128xf32>
    %2 = tpu.matmul %0, %1, %cst {dimension_numbers = #tpu.dot_dimension_numbers<[1], [0], [0], [1], [0, 0, 1, 1], [], []>, precision = #tpu.contract_precision<fp32>} : vector<8x8xf32>, vector<8x128xf32>, vector<8x128xf32> -> vector<8x128xf32>
    %3 = arith.mulf %2, %2 : vector<8x128xf32>
    %c0_3 = arith.constant 0 : index
    %c0_4 = arith.constant 0 : index
    %4 = vector.load %arg3[%c0_3, %c0_4] : memref<128x4xf32, #tpu.memory_space<vmem>>, vector<128x4xf32>
    %cst_5 = arith.constant dense<0.000000e+00> : vector<8x4xf32>
    %5 = tpu.matmul %3, %4, %cst_5 {dimension_numbers = #tpu.dot_dimension_numbers<[1], [0], [0], [1], [0, 0, 1, 1], [], []>, precision = #tpu.contract_precision<fp32>} : vector<8x128xf32>, vector<128x4xf32>, vector<8x4xf32> -> vector<8x4xf32>
    %6 = math.sqrt %5 : vector<8x4xf32>
    %cst_6 = arith.constant 0.000000e+00 : f32
    %7 = vector.broadcast %cst_6 : f32 to vector<8x4xf32>
    %8 = arith.cmpf ogt, %5, %7 : vector<8x4xf32>
    %9 = math.rsqrt %5 : vector<8x4xf32>
    %cst_7 = arith.constant 0.000000e+00 : f32
    %10 = vector.broadcast %cst_7 : f32 to vector<8x4xf32>
    %11 = arith.select %8, %9, %10 : vector<8x4xi1>, vector<8x4xf32>
    %cst_8 = arith.constant 1.000000e+00 : f32
    %12 = vector.broadcast %cst_8 : f32 to vector<8x4xf32>
    %13 = arith.addf %6, %12 : vector<8x4xf32>
    %14 = arith.divf %6, %13 : vector<8x4xf32>
    %c0_9 = arith.constant 0 : index
    %c0_10 = arith.constant 0 : index
    %15 = vector.load %arg4[%c0_9, %c0_10] : memref<4x128xf32, #tpu.memory_space<vmem>>, vector<4x128xf32>
    %cst_11 = arith.constant dense<0.000000e+00> : vector<8x128xf32>
    %16 = tpu.matmul %11, %15, %cst_11 {dimension_numbers = #tpu.dot_dimension_numbers<[1], [0], [0], [1], [0, 0, 1, 1], [], []>, precision = #tpu.contract_precision<fp32>} : vector<8x4xf32>, vector<4x128xf32>, vector<8x128xf32> -> vector<8x128xf32>
    %c0_12 = arith.constant 0 : index
    %c0_13 = arith.constant 0 : index
    %17 = vector.load %arg5[%c0_12, %c0_13] : memref<4x128xf32, #tpu.memory_space<vmem>>, vector<4x128xf32>
    %cst_14 = arith.constant dense<0.000000e+00> : vector<8x128xf32>
    %18 = tpu.matmul %14, %17, %cst_14 {dimension_numbers = #tpu.dot_dimension_numbers<[1], [0], [0], [1], [0, 0, 1, 1], [], []>, precision = #tpu.contract_precision<fp32>} : vector<8x4xf32>, vector<4x128xf32>, vector<8x128xf32> -> vector<8x128xf32>
    %19 = arith.mulf %2, %16 : vector<8x128xf32>
    %20 = arith.addf %19, %18 : vector<8x128xf32>
    %c0_15 = arith.constant 0 : index
    %c0_16 = arith.constant 0 : index
    %21 = vector.load %arg6[%c0_15, %c0_16] : memref<8x128xf32, #tpu.memory_space<vmem>>, vector<8x128xf32>
    tpu.vector_store %arg6[%c0_15, %c0_16], %20 {strides = array<i32>} : memref<8x128xf32, #tpu.memory_space<vmem>>, vector<8x128xf32>,
    return
  }
  func.func @transform_0(%arg0: i32) -> (i32, i32) {
    %c0_i32 = arith.constant 0 : i32
    %c0_i32_0 = arith.constant 0 : i32
    return %arg0, %c0_i32 : i32, i32
  }
  func.func @transform_1(%arg0: i32) -> (i32, i32) {
    %c0_i32 = arith.constant 0 : i32
    %c0_i32_0 = arith.constant 0 : i32
    %c0_i32_1 = arith.constant 0 : i32
    return %c0_i32, %c0_i32_0 : i32, i32
  }
  func.func @transform_2(%arg0: i32) -> (i32, i32) {
    %c0_i32 = arith.constant 0 : i32
    %c0_i32_0 = arith.constant 0 : i32
    %c0_i32_1 = arith.constant 0 : i32
    return %c0_i32, %c0_i32_0 : i32, i32
  }
  func.func @transform_3(%arg0: i32) -> (i32, i32) {
    %c0_i32 = arith.constant 0 : i32
    %c0_i32_0 = arith.constant 0 : i32
    %c0_i32_1 = arith.constant 0 : i32
    return %c0_i32, %c0_i32_0 : i32, i32
  }
  func.func @transform_4(%arg0: i32) -> (i32, i32) {
    %c0_i32 = arith.constant 0 : i32
    %c0_i32_0 = arith.constant 0 : i32
    %c0_i32_1 = arith.constant 0 : i32
    return %c0_i32, %c0_i32_0 : i32, i32
  }
  func.func @transform_5(%arg0: i32) -> (i32, i32) {
    %c0_i32 = arith.constant 0 : i32
    %c0_i32_0 = arith.constant 0 : i32
    return %arg0, %c0_i32 : i32, i32
  }
}

</mosaic_0001>

<bundles_post_ra>
// kernel: tpu_custom_call.1
= control target key start
LH: loop header
LB: loop body
LE: loop exit
PB: predicated region body
PF: predicated region fallthrough
CT: control target
= control target key end

     0   :  { %10 = vsyncpa [#allocation3], 0  ;;  %s3504_s0 = inlined_call_operand.vmem [shape: f32[16,8], index: 0, kind: input, shape index: {}]   ;;  %s3505_s1 = inlined_call_operand.vmem [shape: f32[8,128], index: 1, kind: input, shape index: {}]   ;;  %s3506_s2 = inlined_call_operand.vmem [shape: f32[128,4], index: 2, kind: input, shape index: {}]   ;;  %s3507_s3 = inlined_call_operand.vmem [shape: f32[4,128], index: 3, kind: input, shape index: {}]   ;;  %s3508_s4 = inlined_call_operand.vmem [shape: f32[4,128], index: 4, kind: input, shape index: {}]   ;;  %s3509_s5 = inlined_call_operand.hbm [shape: f32[16,128], index: 5, kind: output, shape index: {}]  }
   0x1   :  { %12 = vsyncpa [#allocation3 + $0x1], 0  ;;  %s2915_s18 = smov 0   ;;  %s2917_s19 = smov 0  }
   0x2   :  { %s2919_s20 = smov 0   ;;  %s2921_s21 = smov 0  }
   0x3 LB: > { %s2936_s22 = sadd.s32 4294967295, %s2880_s21   ;;  %s2327_s23 = sadd.s32 4294967294, %s2880_s21   ;;  %s2880_s21 = sphi %s2921_s21, %s3521_s21   ;;  %s2876_s20 = sphi %s2919_s20, %s3520_s20   ;;  %s2872_s19 = sphi %s2917_s19, %s3519_s19   ;;  %s2868_s18 = sphi %s2915_s18, %s3518_s18  }
   0x4   : > { %s2940_s24 = sadd.s32 1, %s2880_s21   ;;  %s135_s25 = sadd.s32 1, %s2876_s20 }
   0x5   : > { %s132_s26 = ssub.s32 %s2880_s21, %s2940_s24  ;;  %p145_p0 = scmp.ne.s32.totalorder %s2876_s20, %s2872_s19 }
   0x6   : > { %p133_p1 = scmp.eq.s32.totalorder %s132_s26, 0  ;;  %p146_p2 = scmp.eq.s32.totalorder %s2936_s22, 1 }
   0x7   : > { %p151_p3 = scmp.ne.s32.totalorder %s2872_s19, %s2868_s18  ;;  %p152_p4 = scmp.eq.s32.totalorder %s2327_s23, 1 }
   0x8   : > { %s2951_s27 = scalar_select %p133_p1, %s2876_s20, %s135_s25  }
   0x9   : > { %p2953_p5 = por %p146_p2, %p145_p0  ;;  %p2957_p6 = por %p152_p4, %p151_p3 }
   0xa   : > { %p2330_p7 = scmp.ge.s32.totalorder %s2880_s21, 1  ;;  %p189_p8 = scmp.lt.s32.totalorder %s2880_s21, 3 }
   0xc   : > { %p190_p9 = pnand %p2330_p7, %p189_p8 }
   0xd   : > { %p216_p10 = scmp.lt.s32.totalorder (!%p190_p9), %s2936_s22, 1  ;;  %s213_s16 = sand.u32 (!%p190_p9), 1, %s2872_s19  }
   0xe   : > { %193 = sbr.rel (%p190_p9) target bundleno = 783 (0x30f), region = 40  ;;  %s2334_s23 = sshll.u32 (!%p190_p9), %s2936_s22, 7 }
   0xf   : > { %s2266_s7 = scalar_lea.hbm (!%p190_p9), %s3509_s5, %s2334_s23  ;;  %s2255_s8 = scalar_lea.sflag (!%p190_p9), [#allocation3], %s213_s16 }
  0x10   : > { %s2884_s10 = smov (!%p190_p9), [#allocation2]  }
  0x13   : > { %v221_v0 = vld [vmem:[%s3505_s1] sm:$0xff]  ;;  %v688_v1 = vld [vmem:[%s3506_s2 + $0x78] sm:$0xff]  ;;  %v2882_v2 = vmov 0.0   ;;  %v687_v5 = vld [vmem:[%s3506_s2 + $0x70] sm:$0xff]  ;;  %vm2883_vm0 = vmmov 0   ;;  %s217_s11 = scalar_select %p216_p10, %s2936_s22, 1 }
  0x14   : > { %2475 = vmatprep.subr.mxu0 %v2882_v2  ;;  %v257_v3 = vand.u32 4294901760, %v221_v0  ;;  %2480 = vmatprep.subr.mxu1 %v2882_v2  ;;  %v2972_v4 = vand.u32 4294901760, %v688_v1  ;;  %v686_v7 = vld [vmem:[%s3506_s2 + $0x68] sm:$0xff]  ;;  %vm222_vm1 = vcmask 64512   ;;  %v2988_v8 = vand.u32 4294901760, %v687_v5  ;;  %v685_v11 = vld [vmem:[%s3506_s2 + $0x60] sm:$0xff] }
  0x15   : > { %2477 = vmatprep.mubr.msk.f32.mxu0 %vm2883_vm0, %v2882_v2  ;;  %2482 = vmatprep.mubr.msk.f32.mxu1 %vm2883_vm0, %v2882_v2  ;;  %s2332_s14 = sshll.u32 %s217_s11, 3  ;;  %v3000_v13 = vand.u32 4294901760, %v686_v7  ;;  %v684_v16 = vld [vmem:[%s3506_s2 + $0x58] sm:$0xff]  ;;  %v3011_v19 = vand.u32 4294901760, %v685_v11  ;;  %v683_v20 = vld [vmem:[%s3506_s2 + $0x50] sm:$0xff]  ;;  %v682_v27 = vld [vmem:[%s3506_s2 + $0x48] sm:$0xff] }
  0x16   : > { %2476 = vmatpush3.msra.mxu0 %v257_v3  ;;  %v2982_v6 = vsub.f32 %v221_v0, %v257_v3  ;;  %s219_s17 = scalar_lea.vmem %s3504_s0, %s2332_s14  ;;  %v2995_v10 = vsub.f32 %v688_v1, %v2972_v4  ;;  %v3009_v18 = vsub.f32 %v687_v5, %v2988_v8  ;;  %v3020_v25 = vand.u32 4294901760, %v684_v16  ;;  %v681_v32 = vld [vmem:[%s3506_s2 + $0x40] sm:$0xff]  ;;  %v680_v62 = vld [vmem:[%s3506_s2 + $0x38] sm:$0xff]  ;;  %v679_v0 = vld [vmem:[%s3506_s2 + $0x30] sm:$0xff]  ;;  %s2824_s22 = sshll.u32 %s2884_s10, 4  ;;  %s2825_s22 = int_to_ptr.vmem [resolvable:$false] %s2824_s22 }
  0x17   : > { %2485 = vmatprep.subr.mxu0 %v2882_v2  ;;  %v220_v12 = vld [vmem:[%s219_s17] sm:$0xff]  ;;  %v3018_v24 = vsub.f32 %v686_v7, %v3000_v13  ;;  %v3022_v26 = vand.u32 4294901760, %v683_v20  ;;  %v3030_v30 = vsub.f32 %v685_v11, %v3011_v19  ;;  %v3045_v36 = vand.u32 4294901760, %v682_v27  ;;  %v678_v5 = vld [vmem:[%s3506_s2 + $0x28] sm:$0xff]  ;;  %s2331_s17 = sshll.u32 %s213_s16, 3  ;;  %s2826_s11 = scalar_lea.vmem %s2825_s22, 256 }
  0x18   : > { %v335_v9 = vand.u32 4294901760, %v2982_v6  ;;  %v224_v15 = vsel %vm222_vm1, %v220_v12, 0  ;;  %v783_v22 = vand.u32 4294901760, %v2995_v10  ;;  %v790_v29 = vand.u32 4294901760, %v3009_v18  ;;  %v677_v11 = vld [vmem:[%s3506_s2 + $0x20] sm:$0xff]  ;;  %s215_s25 = scalar_lea.vmem [#allocation2], %s2331_s17 }
  0x19   : > { %v292_v17 = vand.u32 4294901760, %v224_v15  ;;  %v797_v34 = vand.u32 4294901760, %v3018_v24  ;;  %v3043_v35 = vsub.f32 %v684_v16, %v3020_v25  ;;  %v3048_v37 = vsub.f32 %v683_v20, %v3022_v26  ;;  %s2268_s26 = sshll.u32 %s215_s25, 4  ;;  %s2269_s26 = int_to_ptr.vmem [resolvable:$true] %s2268_s26 }
  0x1a   : > { %v336_v14 = vsub.f32 %v2982_v6, %v335_v9  ;;  %v784_v31 = vsub.f32 %v2995_v10, %v783_v22  ;;  %v791_v39 = vsub.f32 %v3009_v18, %v790_v29  ;;  %v804_v40 = vand.u32 4294901760, %v3030_v30  ;;  %s2820_s9 = scalar_lea.vmem %s2269_s26, 128  ;;  %p2827_p0 = scmp.lt.s32.totalorder %s2269_s26, %s2825_s22 }
  0x1b   : > { %v293_v23 = vsub.f32 %v224_v15, %v292_v17  ;;  %v3054_v41 = vand.u32 4294901760, %v681_v32  ;;  %v798_v43 = vsub.f32 %v3018_v24, %v797_v34  ;;  %v811_v44 = vand.u32 4294901760, %v3043_v35  ;;  %p2821_p11 = scmp.ne.s32.totalorder %s2269_s26, %s2820_s9  ;;  %p2828_p1 = scmp.lt.s32.totalorder %s2826_s11, %s2820_s9 }
  0x1c   : > { %v337_v21 = vand.u32 4294901760, %v336_v14  ;;  %v785_v42 = vand.u32 4294901760, %v784_v31  ;;  %v3064_v45 = vsub.f32 %v682_v27, %v3045_v36  ;;  %v792_v46 = vand.u32 4294901760, %v791_v39  ;;  %v675_v31 = vld [vmem:[%s3506_s2 + $0x10] sm:$0xff] }
  0x1d   : > { %v294_v28 = vand.u32 4294901760, %v293_v23  ;;  %v805_v47 = vsub.f32 %v3030_v30, %v804_v40  ;;  %v818_v48 = vand.u32 4294901760, %v3048_v37  ;;  %v3075_v49 = vsub.f32 %v681_v32, %v3054_v41  ;;  %p2822_p12 = pnand %p2821_p11, %p2953_p5  ;;  %p2829_p2 = por %p2828_p1, %p2827_p0 }
  0x1e   : > { %2481 = vmatpush3.msra.mxu1 %v337_v21  ;;  %v799_v50 = vand.u32 4294901760, %v798_v43  ;;  %v812_v51 = vsub.f32 %v3043_v35, %v811_v44  ;;  %v825_v52 = vand.u32 4294901760, %v3064_v45  ;;  %v3127_v63 = vand.u32 4294901760, %v680_v62  ;;  %v674_v43 = vld [vmem:[%s3506_s2 + $0x8] sm:$0xff] }
  0x1f   : > { %2483 = vmatmul.mubr.f32.vlgmr.msra.gmra.mxu1 %v292_v17  ;;  %2490 = vmatprep.subr.mxu1 %v2882_v2  ;;  %v295_v33 = vsub.f32 %v293_v23, %v294_v28  ;;  %v806_v53 = vand.u32 4294901760, %v805_v47  ;;  %v819_v54 = vsub.f32 %v3048_v37, %v818_v48  ;;  %v832_v55 = vand.u32 4294901760, %v3075_v49  ;;  %p2823_p13 = pneg %p2822_p12 }
  0x20   : > { %2491 = vmatpush3.msra.mxu1 %v257_v3  ;;  %2492 = vmatprep.mubr.msk.f32.mxu1 %vm2883_vm0, %v2882_v2  ;;  %v813_v56 = vand.u32 4294901760, %v812_v51  ;;  %v826_v57 = vsub.f32 %v3064_v45, %v825_v52  ;;  %v3133_v1 = vsub.f32 %v680_v62, %v3127_v63  ;;  %v3160_v16 = vand.u32 4294901760, %v677_v11 }
  0x21   : > { %2500 = vmatprep.subr.mxu1 %v2882_v2  ;;  %v296_v38 = vand.u32 4294901760, %v295_v33  ;;  %v820_v58 = vand.u32 4294901760, %v819_v54  ;;  %v833_v59 = vsub.f32 %v3075_v49, %v832_v55  ;;  %v3185_v39 = vand.u32 4294901760, %v675_v31  ;;  %v673_v54 = vld [vmem:[%s3506_s2] sm:$0xff]  ;;  %p2830_p3 = pnand %p2829_p2, %p2823_p13 }
  0x22   : > { %v827_v60 = vand.u32 4294901760, %v826_v57  ;;  %v3172_v27 = vsub.f32 %v677_v11, %v3160_v16  ;;  %v3201_v51 = vand.u32 4294901760, %v674_v43  ;;  %vm1348_vm2 = vcmask 1043456  }
  0x23   : > { %2493 = vmatmul.mubr.f32.vlgmr.msra.gmra.mxu1 %v294_v28  ;;  %2478 = vmatmul.mubr.f32.vlgmr.msra.gmra.mxu0 %v296_v38  ;;  %v834_v61 = vand.u32 4294901760, %v833_v59  ;;  %v3214_v59 = vand.u32 4294901760, %v673_v54  ;;  %vm1344_vm3 = vcmask 31744  }
  0x24   : > { %2501 = vmatpush3.msra.mxu1 %v257_v3  ;;  %2502 = vmatprep.mubr.msk.f32.mxu1 %vm2883_vm0, %v2882_v2  ;;  %v3135_v3 = vand.u32 4294901760, %v679_v0  ;;  %v860_v38 = vand.u32 4294901760, %v3172_v27 }
  0x25   : > { %2540 = vmatprep.subr.mxu1 %v2882_v2  ;;  %2486 = vmatpush3.msra.mxu0 %v2982_v6  ;;  %v839_v6 = vand.u32 4294901760, %v3133_v1 }
  0x26   : > { %2487 = vmatprep.mubr.msk.f32.mxu0 %vm2883_vm0, %v2882_v2  ;;  %2495 = vmatprep.subr.mxu0 %v2882_v2  ;;  %v3144_v7 = vsub.f32 %v679_v0, %v3135_v3  ;;  %v861_v47 = vsub.f32 %v3172_v27, %v860_v38  ;;  %v3227_v0 = vsub.f32 %v673_v54, %v3214_v59 }
  0x27   : > { %2503 = vmatmul.mubr.f32.vlgmr.msra.gmra.mxu1 %v292_v17  ;;  %2488 = vmatmul.mubr.f32.vlgmr.msra.gmra.mxu0 %v293_v23  ;;  %v840_v12 = vsub.f32 %v3133_v1, %v839_v6 }
  0x28   : > { %2541 = vmatpush3.msra.mxu1 %v785_v42  ;;  %2572 = vmatprep.mubr.msk.f32.mxu1 %vm2883_vm0, %v2882_v2  ;;  %v846_v14 = vand.u32 4294901760, %v3144_v7 }
  0x29   : > { %2542 = vmatprep.subr.mxu1 %v2882_v2  ;;  %2496 = vmatpush3.msra.mxu0 %v335_v9  ;;  %v3146_v9 = vand.u32 4294901760, %v678_v5  ;;  %v841_v20 = vand.u32 4294901760, %v840_v12 }
  0x2a   : > { %2497 = vmatprep.mubr.msk.f32.mxu0 %vm2883_vm0, %v2882_v2  ;;  %2543 = vmatpush3.msra.mxu1 %v792_v46  ;;  %v847_v21 = vsub.f32 %v3144_v7, %v846_v14 }
  0x2b   : > { %2505 = vmatprep.subr.mxu0 %v2882_v2  ;;  %2544 = vmatprep.subr.mxu1 %v2882_v2  ;;  %v3158_v15 = vsub.f32 %v678_v5, %v3146_v9 }
  0x2c   : > { %2498 = vmatmul.mubr.f32.vlgmr.msra.gmra.mxu0 %v292_v17  ;;  %2545 = vmatpush3.msra.mxu1 %v799_v50  ;;  %v676_v17 = vld [vmem:[%s3506_s2 + $0x18] sm:$0xff]  ;;  %v848_v32 = vand.u32 4294901760, %v847_v21  ;;  %v3199_v50 = vsub.f32 %v675_v31, %v3185_v39 }
  0x2d   : > { %2546 = vmatprep.subr.mxu1 %v2882_v2  ;;  %2506 = vmatpush3.msra.mxu0 %v2972_v4  ;;  %v853_v23 = vand.u32 4294901760, %v3158_v15  ;;  %v3175_v28 = vand.u32 4294901760, %v676_v17 }
  0x2e   : > { %2547 = vmatpush3.msra.mxu1 %v806_v53  ;;  %2507 = vmatprep.subr.mxu0 %v2882_v2  ;;  %v3512_v57 = vand.u32 4294901760, %v3199_v50 }
  0x2f   : > { %2548 = vmatprep.subr.mxu1 %v2882_v2  ;;  %2508 = vmatpush3.msra.mxu0 %v2988_v8  ;;  %v854_v33 = vsub.f32 %v3158_v15, %v853_v23  ;;  %v3189_v42 = vsub.f32 %v676_v17, %v3175_v28  ;;  %v3510_v17 = vand.u32 4294901760, %v3227_v0 }
  0x30   : > { %2549 = vmatpush3.msra.mxu1 %v813_v56  ;;  %2509 = vmatprep.subr.mxu0 %v2882_v2  ;;  %v862_v56 = vand.u32 4294901760, %v861_v47 }
  0x31   : > { %2550 = vmatprep.subr.mxu1 %v2882_v2  ;;  %2510 = vmatpush3.msra.mxu0 %v3000_v13  ;;  %v855_v46 = vand.u32 4294901760, %v854_v33  ;;  %v867_v53 = vand.u32 4294901760, %v3189_v42  ;;  %v889_v21 = vsub.f32 %v3227_v0, %v3510_v17 }
  0x32   : > { %2551 = vmatpush3.msra.mxu1 %v820_v58  ;;  %2511 = vmatprep.subr.mxu0 %v2882_v2  ;;  %v3212_v58 = vsub.f32 %v674_v43, %v3201_v51 }
  0x33   : > { %2552 = vmatprep.subr.mxu1 %v2882_v2  ;;  %2512 = vmatpush3.msra.mxu0 %v3011_v19  ;;  %v890_v31 = vand.u32 4294901760, %v889_v21 }
  0x34   : > { %2553 = vmatpush3.msra.mxu1 %v827_v60  ;;  %2513 = vmatprep.subr.mxu0 %v2882_v2  ;;  %v868_v60 = vsub.f32 %v3189_v42, %v867_v53  ;;  %v3511_v62 = vand.u32 4294901760, %v3212_v58 }
  0x35   : > { %2554 = vmatprep.subr.mxu1 %v2882_v2  ;;  %2514 = vmatpush3.msra.mxu0 %v3020_v25 }
  0x36   : > { %2555 = vmatpush3.msra.mxu1 %v834_v61  ;;  %2515 = vmatprep.subr.mxu0 %v2882_v2  ;;  %v875_v61 = vsub.f32 %v3199_v50, %v3512_v57  ;;  %v869_v5 = vand.u32 4294901760, %v868_v60  ;;  %v882_v12 = vsub.f32 %v3212_v58, %v3511_v62 }
  0x37   : > { %2556 = vmatprep.subr.mxu1 %v2882_v2  ;;  %2516 = vmatpush3.msra.mxu0 %v3022_v26 }
  0x38   : > { %2517 = vmatprep.subr.mxu0 %v2882_v2  ;;  %2537 = vmatprep.mubr.msk.f32.mxu0 %vm2883_vm0, %v2882_v2  ;;  %v876_v11 = vand.u32 4294901760, %v875_v61 }
  0x39   : > { %2518 = vmatpush3.msra.mxu0 %v3045_v36  ;;  %2557 = vmatpush3.msra.mxu1 %v841_v20  ;;  %v883_v20 = vand.u32 4294901760, %v882_v12 }
  0x3a   : > { %2519 = vmatprep.subr.mxu0 %v2882_v2  ;;  %2558 = vmatprep.subr.mxu1 %v2882_v2 }
  0x3b   : > { %2520 = vmatpush3.msra.mxu0 %v3054_v41  ;;  %2559 = vmatpush3.msra.mxu1 %v848_v32 }
  0x3c   : > { %2521 = vmatprep.subr.mxu0 %v2882_v2  ;;  %2560 = vmatprep.subr.mxu1 %v2882_v2 }
  0x3d   : > { %2522 = vmatpush3.msra.mxu0 %v3127_v63  ;;  %2561 = vmatpush3.msra.mxu1 %v855_v46 }
  0x3e   : > { %2523 = vmatprep.subr.mxu0 %v2882_v2  ;;  %2562 = vmatprep.subr.mxu1 %v2882_v2 }
  0x3f   : > { %2524 = vmatpush3.msra.mxu0 %v3135_v3  ;;  %2563 = vmatpush3.msra.mxu1 %v862_v56 }
  0x40   : > { %2525 = vmatprep.subr.mxu0 %v2882_v2  ;;  %2564 = vmatprep.subr.mxu1 %v2882_v2 }
  0x41   : > { %2526 = vmatpush3.msra.mxu0 %v3146_v9  ;;  %2565 = vmatpush3.msra.mxu1 %v869_v5 }
  0x42   : > { %2527 = vmatprep.subr.mxu0 %v2882_v2  ;;  %2566 = vmatprep.subr.mxu1 %v2882_v2 }
  0x43   : > { %2528 = vmatpush3.msra.mxu0 %v3160_v16  ;;  %2567 = vmatpush3.msra.mxu1 %v876_v11 }
  0x44   : > { %2529 = vmatprep.subr.mxu0 %v2882_v2  ;;  %2568 = vmatprep.subr.mxu1 %v2882_v2 }
  0x45   : > { %2530 = vmatpush3.msra.mxu0 %v3175_v28  ;;  %2569 = vmatpush3.msra.mxu1 %v883_v20 }
  0x46   : > { %2531 = vmatprep.subr.mxu0 %v2882_v2  ;;  %2570 = vmatprep.subr.mxu1 %v2882_v2 }
  0x47   : > { %2532 = vmatpush3.msra.mxu0 %v3185_v39  ;;  %2571 = vmatpush3.msra.mxu1 %v890_v31 }
  0x48   : > { %2533 = vmatprep.subr.mxu0 %v2882_v2  ;;  %2610 = vmatprep.subr.mxu1 %v2882_v2 }
  0x49   : > { %2534 = vmatpush3.msra.mxu0 %v3201_v51 }
  0x4a   : > { %2535 = vmatprep.subr.mxu0 %v2882_v2 }
  0x4b   : > { %2536 = vmatpush3.msra.mxu0 %v3214_v59 }
  0x4c   : > { %2575 = vmatprep.subr.mxu0 %v2882_v2 }
  0xdf   : > { %v374_v32 = vpop.f32.mrf.mxu1 }
  0xe1   : > { %v2484_v33 = vpop.f32.mrf.mxu1 }
  0xe3   : > { %v522_v43 = vpop.f32.mrf.mxu1  ;;  %v298_v46 = vpop.f32.mrf.mxu0 }
  0xe4   : > { %v375_v60 = vadd.f32 %v374_v32, %v298_v46 }
  0xe5   : > { %v2494_v47 = vpop.f32.mrf.mxu1  ;;  %v2479_v54 = vpop.f32.mrf.mxu0 }
  0xe7   : > { %v668_v56 = vpop.f32.mrf.mxu1  ;;  %v448_v61 = vpop.f32.mrf.mxu0 }
  0xe8   : > { %v449_v11 = vadd.f32 %v448_v61, %v375_v60 }
  0xe9   : > { %v2504_v5 = vpop.f32.mrf.mxu1  ;;  %v2489_v12 = vpop.f32.mrf.mxu0 }
  0xea   : > { %v523_v17 = vadd.f32 %v522_v43, %v449_v11 }
  0xec   : > { %v596_v21 = vpop.f32.mrf.mxu0 }
  0xed   : > { %v597_v20 = vadd.f32 %v596_v21, %v523_v17 }
  0xee   : > { %v2499_v62 = vpop.f32.mrf.mxu0 }
  0xef   : > { %v3244_v57 = vadd.f32 %v668_v56, %v597_v20 }
  0xf1   : > { %v672_v31 = vmul.f32 %v3244_v57, %v3244_v57 }
  0xf3   : > { %v3248_v33 = vand.u32 4294901760, %v672_v31 }
  0xf5   : > { %v3251_v47 = vsub.f32 %v672_v31, %v3248_v33  ;;  %2573 = vmatmul.mubr.f32.vlgmr.msra.gmra.mxu1 %v3248_v33 }
  0xf6   : > { %2611 = vmatpush3.msra.mxu1 %v2972_v4  ;;  %2642 = vmatprep.mubr.msk.f32.mxu1 %vm2883_vm0, %v2882_v2 }
  0xf7   : > { %v772_v17 = vand.u32 4294901760, %v3251_v47  ;;  %2612 = vmatprep.subr.mxu1 %v2882_v2 }
  0xf8   : > { %2613 = vmatpush3.msra.mxu1 %v2988_v8 }
  0xf9   : > { %2614 = vmatprep.subr.mxu1 %v2882_v2  ;;  %v773_v62 = vsub.f32 %v3251_v47, %v772_v17 }
  0xfa   : > { %2615 = vmatpush3.msra.mxu1 %v3000_v13 }
  0xfb   : > { %2616 = vmatprep.subr.mxu1 %v2882_v2  ;;  %v774_v32 = vand.u32 4294901760, %v773_v62 }
  0xfc   : > { %2617 = vmatpush3.msra.mxu1 %v3011_v19 }
  0xfd   : > { %2618 = vmatprep.subr.mxu1 %v2882_v2  ;;  %2538 = vmatmul.mubr.f32.vlgmr.msra.gmra.mxu0 %v774_v32 }
  0xfe   : > { %2576 = vmatpush3.msra.mxu0 %v2995_v10  ;;  %2619 = vmatpush3.msra.mxu1 %v3020_v25  ;;  %v3517_v10 = vand.u32 4294901760, %v3227_v0 }
  0xff   : > { %2577 = vmatprep.subr.mxu0 %v2882_v2  ;;  %2620 = vmatprep.subr.mxu1 %v2882_v2 }
 0x100   : > { %2578 = vmatpush3.msra.mxu0 %v3009_v18  ;;  %2621 = vmatpush3.msra.mxu1 %v3022_v26 }
 0x101   : > { %2579 = vmatprep.subr.mxu0 %v2882_v2  ;;  %2622 = vmatprep.subr.mxu1 %v2882_v2 }
 0x102   : > { %2580 = vmatpush3.msra.mxu0 %v3018_v24  ;;  %2623 = vmatpush3.msra.mxu1 %v3045_v36 }
 0x103   : > { %2581 = vmatprep.subr.mxu0 %v2882_v2  ;;  %2624 = vmatprep.subr.mxu1 %v2882_v2 }
 0x104   : > { %2582 = vmatpush3.msra.mxu0 %v3030_v30  ;;  %2625 = vmatpush3.msra.mxu1 %v3054_v41 }
 0x105   : > { %2583 = vmatprep.subr.mxu0 %v2882_v2  ;;  %2626 = vmatprep.subr.mxu1 %v2882_v2 }
 0x106   : > { %2584 = vmatpush3.msra.mxu0 %v3043_v35  ;;  %2627 = vmatpush3.msra.mxu1 %v3127_v63 }
 0x107   : > { %2585 = vmatprep.subr.mxu0 %v2882_v2  ;;  %2628 = vmatprep.subr.mxu1 %v2882_v2 }
 0x108   : > { %2586 = vmatpush3.msra.mxu0 %v3048_v37  ;;  %2629 = vmatpush3.msra.mxu1 %v3135_v3 }
 0x109   : > { %2587 = vmatprep.subr.mxu0 %v2882_v2  ;;  %2630 = vmatprep.subr.mxu1 %v2882_v2 }
 0x10a   : > { %2588 = vmatpush3.msra.mxu0 %v3064_v45  ;;  %2631 = vmatpush3.msra.mxu1 %v3146_v9 }
 0x10b   : > { %2589 = vmatprep.subr.mxu0 %v2882_v2  ;;  %2632 = vmatprep.subr.mxu1 %v2882_v2 }
 0x10c   : > { %2590 = vmatpush3.msra.mxu0 %v3075_v49  ;;  %2633 = vmatpush3.msra.mxu1 %v3160_v16 }
 0x10d   : > { %2591 = vmatprep.subr.mxu0 %v2882_v2  ;;  %2634 = vmatprep.subr.mxu1 %v2882_v2 }
 0x10e   : > { %2592 = vmatpush3.msra.mxu0 %v3133_v1  ;;  %2635 = vmatpush3.msra.mxu1 %v3175_v28 }
 0x10f   : > { %2593 = vmatprep.subr.mxu0 %v2882_v2  ;;  %2636 = vmatprep.subr.mxu1 %v2882_v2 }
 0x110   : > { %2594 = vmatpush3.msra.mxu0 %v3144_v7  ;;  %2637 = vmatpush3.msra.mxu1 %v3185_v39 }
 0x111   : > { %2595 = vmatprep.subr.mxu0 %v2882_v2  ;;  %2638 = vmatprep.subr.mxu1 %v2882_v2 }
 0x112   : > { %2596 = vmatpush3.msra.mxu0 %v3158_v15  ;;  %2639 = vmatpush3.msra.mxu1 %v3201_v51 }
 0x113   : > { %2597 = vmatprep.subr.mxu0 %v2882_v2  ;;  %2640 = vmatprep.subr.mxu1 %v2882_v2 }
 0x114   : > { %2598 = vmatpush3.msra.mxu0 %v3172_v27  ;;  %2641 = vmatpush3.msra.mxu1 %v3214_v59 }
 0x115   : > { %2599 = vmatprep.subr.mxu0 %v2882_v2  ;;  %2643 = vmatmul.mubr.f32.vlgmr.msra.gmra.mxu1 %v772_v17 }
 0x116   : > { %2680 = vmatprep.subr.mxu1 %v2882_v2  ;;  %2600 = vmatpush3.msra.mxu0 %v3189_v42 }
 0x117   : > { %2681 = vmatpush3.msra.mxu1 %v2972_v4  ;;  %2601 = vmatprep.subr.mxu0 %v2882_v2  ;;  %v3515_v4 = vand.u32 4294901760, %v3199_v50 }
 0x118   : > { %2682 = vmatprep.subr.mxu1 %v2882_v2  ;;  %2602 = vmatpush3.msra.mxu0 %v3199_v50 }
 0x119   : > { %2683 = vmatpush3.msra.mxu1 %v2988_v8  ;;  %2603 = vmatprep.subr.mxu0 %v2882_v2  ;;  %v3516_v8 = vand.u32 4294901760, %v3212_v58 }
 0x11a   : > { %2684 = vmatprep.subr.mxu1 %v2882_v2  ;;  %2604 = vmatpush3.msra.mxu0 %v3212_v58 }
 0x11b   : > { %2685 = vmatpush3.msra.mxu1 %v3000_v13  ;;  %2605 = vmatprep.subr.mxu0 %v2882_v2  ;;  %v1343_v13 = vld [vmem:[%s3507_s3] sm:$0xf] }
 0x11c   : > { %2686 = vmatprep.subr.mxu1 %v2882_v2  ;;  %2606 = vmatpush3.msra.mxu0 %v3227_v0  ;;  %v1350_v18 = vsel %vm1348_vm2, %v1343_v13, 0 }
 0x11d   : > { %2607 = vmatprep.mubr.msk.f32.mxu0 %vm2883_vm0, %v2882_v2  ;;  %2687 = vmatpush3.msra.mxu1 %v3011_v19  ;;  %v1383_v19 = vand.u32 4294901760, %v1350_v18 }
 0x11e   : > { %2608 = vmatmul.mubr.f32.vlgmr.msra.gmra.mxu0 %v3251_v47  ;;  %2645 = vmatprep.subr.mxu0 %v2882_v2 }
 0x11f   : > { %2688 = vmatprep.subr.mxu1 %v2882_v2  ;;  %2646 = vmatpush3.msra.mxu0 %v783_v22  ;;  %v3419_v22 = vsub.f32 %v1350_v18, %v1383_v19 }
 0x120   : > { %2689 = vmatpush3.msra.mxu1 %v3020_v25  ;;  %2647 = vmatprep.subr.mxu0 %v2882_v2 }
 0x121   : > { %2690 = vmatprep.subr.mxu1 %v2882_v2  ;;  %2648 = vmatpush3.msra.mxu0 %v790_v29  ;;  %v1461_v24 = vand.u32 4294901760, %v3419_v22 }
 0x122   : > { %2691 = vmatpush3.msra.mxu1 %v3022_v26  ;;  %2649 = vmatprep.subr.mxu0 %v2882_v2 }
 0x123   : > { %2692 = vmatprep.subr.mxu1 %v2882_v2  ;;  %2650 = vmatpush3.msra.mxu0 %v797_v34  ;;  %v1462_v25 = vsub.f32 %v3419_v22, %v1461_v24 }
 0x124   : > { %2693 = vmatpush3.msra.mxu1 %v3045_v36  ;;  %2651 = vmatprep.subr.mxu0 %v2882_v2 }
 0x125   : > { %2694 = vmatprep.subr.mxu1 %v2882_v2  ;;  %2652 = vmatpush3.msra.mxu0 %v804_v40  ;;  %v1463_v26 = vand.u32 4294901760, %v1462_v25 }
 0x126   : > { %2695 = vmatpush3.msra.mxu1 %v3054_v41  ;;  %2653 = vmatprep.subr.mxu0 %v2882_v2 }
 0x127   : > { %2696 = vmatprep.subr.mxu1 %v2882_v2  ;;  %2654 = vmatpush3.msra.mxu0 %v811_v44 }
 0x128   : > { %2697 = vmatpush3.msra.mxu1 %v3127_v63  ;;  %2655 = vmatprep.subr.mxu0 %v2882_v2 }
 0x129   : > { %2698 = vmatprep.subr.mxu1 %v2882_v2  ;;  %2656 = vmatpush3.msra.mxu0 %v818_v48 }
 0x12a   : > { %2699 = vmatpush3.msra.mxu1 %v3135_v3  ;;  %2657 = vmatprep.subr.mxu0 %v2882_v2 }
 0x12b   : > { %2700 = vmatprep.subr.mxu1 %v2882_v2  ;;  %2658 = vmatpush3.msra.mxu0 %v825_v52 }
 0x12c   : > { %2701 = vmatpush3.msra.mxu1 %v3146_v9  ;;  %2659 = vmatprep.subr.mxu0 %v2882_v2 }
 0x12d   : > { %2702 = vmatprep.subr.mxu1 %v2882_v2  ;;  %2660 = vmatpush3.msra.mxu0 %v832_v55 }
 0x12e   : > { %2703 = vmatpush3.msra.mxu1 %v3160_v16  ;;  %2661 = vmatprep.subr.mxu0 %v2882_v2 }
 0x12f   : > { %2704 = vmatprep.subr.mxu1 %v2882_v2  ;;  %2662 = vmatpush3.msra.mxu0 %v839_v6  ;;  %v1798_v6 = vld [vmem:[%s3508_s4] sm:$0xf] }
 0x130   : > { %2705 = vmatpush3.msra.mxu1 %v3175_v28  ;;  %2663 = vmatprep.subr.mxu0 %v2882_v2  ;;  %v1803_v7 = vsel %vm1348_vm2, %v1798_v6, 0 }
 0x131   : > { %2706 = vmatprep.subr.mxu1 %v2882_v2  ;;  %2664 = vmatpush3.msra.mxu0 %v846_v14  ;;  %v1836_v9 = vand.u32 4294901760, %v1803_v7 }
 0x132   : > { %2707 = vmatpush3.msra.mxu1 %v3185_v39  ;;  %2665 = vmatprep.subr.mxu0 %v2882_v2 }
 0x133   : > { %2708 = vmatprep.subr.mxu1 %v2882_v2  ;;  %2666 = vmatpush3.msra.mxu0 %v853_v23  ;;  %v3431_v14 = vsub.f32 %v1803_v7, %v1836_v9 }
 0x134   : > { %2709 = vmatpush3.msra.mxu1 %v3201_v51  ;;  %2667 = vmatprep.subr.mxu0 %v2882_v2 }
 0x135   : > { %2710 = vmatprep.subr.mxu1 %v2882_v2  ;;  %2668 = vmatpush3.msra.mxu0 %v860_v38  ;;  %v1914_v39 = vand.u32 4294901760, %v3431_v14 }
 0x136   : > { %2711 = vmatpush3.msra.mxu1 %v3214_v59  ;;  %2712 = vmatprep.mubr.msk.f32.mxu1 %vm2883_vm0, %v2882_v2 }
 0x137   : > { %2669 = vmatprep.subr.mxu0 %v2882_v2  ;;  %2713 = vmatmul.mubr.f32.vlgmr.msra.gmra.mxu1 %v3248_v33  ;;  %v1915_v59 = vsub.f32 %v3431_v14, %v1914_v39 }
 0x138   : > { %2670 = vmatpush3.msra.mxu0 %v867_v53  ;;  %2677 = vmatprep.mubr.msk.f32.mxu0 %vm2883_vm0, %v2882_v2 }
 0x139   : > { %2671 = vmatprep.subr.mxu0 %v2882_v2  ;;  %2720 = vmatprep.subr.mxu1 %v2882_v2  ;;  %v1916_v46 = vand.u32 4294901760, %v1915_v59 }
 0x13a   : > { %2672 = vmatpush3.msra.mxu0 %v3515_v4  ;;  %2722 = vmatprep.mubr.msk.f32.mxu1 %vm2883_vm0, %v2882_v2 }
 0x13b   : > { %2673 = vmatprep.subr.mxu0 %v2882_v2  ;;  %2721 = vmatpush3.msra.mxu1 %v1463_v26 }
 0x13c   : > { %2674 = vmatpush3.msra.mxu0 %v3516_v8  ;;  %2730 = vmatprep.subr.mxu1 %v2882_v2 }
 0x13d   : > { %2675 = vmatprep.subr.mxu0 %v2882_v2 }
 0x13e   : > { %2676 = vmatpush3.msra.mxu0 %v3517_v10 }
 0x13f   : > { %2678 = vmatmul.mubr.f32.vlgmr.msra.gmra.mxu0 %v3248_v33  ;;  %2715 = vmatprep.subr.mxu0 %v2882_v2 }
 0x140   : > { %2717 = vmatprep.mubr.msk.f32.mxu0 %vm2883_vm0, %v2882_v2  ;;  %2716 = vmatpush3.msra.mxu0 %v1383_v19 }
 0x141   : > { %2725 = vmatprep.subr.mxu0 %v2882_v2 }
 0x1b5   : > { %v927_v29 = vpop.f32.mrf.mxu1 }
 0x1b7   : > { %v2574_v30 = vpop.f32.mrf.mxu1 }
 0x1bd   : > { %v776_v34 = vpop.f32.mrf.mxu0 }
 0x1be   : > { %v928_v45 = vadd.f32 %v927_v29, %v776_v34 }
 0x1bf   : > { %v2539_v35 = vpop.f32.mrf.mxu0 }
 0x1d5   : > { %v1120_v36 = vpop.f32.mrf.mxu1 }
 0x1d7   : > { %v2644_v37 = vpop.f32.mrf.mxu1 }
 0x1de   : > { %v1031_v40 = vpop.f32.mrf.mxu0 }
 0x1df   : > { %v1032_v49 = vadd.f32 %v1031_v40, %v928_v45 }
 0x1e0   : > { %v2609_v41 = vpop.f32.mrf.mxu0 }
 0x1e1   : > { %v1121_v52 = vadd.f32 %v1120_v36, %v1032_v49 }
 0x1f7   : > { %v1326_v44 = vpop.f32.mrf.mxu1 }
 0x1f9   : > { %v2714_v48 = vpop.f32.mrf.mxu1 }
 0x1ff   : > { %v1239_v55 = vpop.f32.mrf.mxu0 }
 0x200   : > { %v1240_v63 = vadd.f32 %v1239_v55, %v1121_v52 }
 0x201   : > { %v2679_v1 = vpop.f32.mrf.mxu0 }
 0x202   : > { %v1327_v3 = vadd.f32 %v1326_v44, %v1240_v63 }
 0x204   : > { %2816 = vrsqrt.f32 %v1327_v3  ;;  %vm1337_vm4 = vcmp.gt.f32.partialorder %v1327_v3, 0.0  ;;  %vm1332_vm5 = vcmp.eq.f32.partialorder %v1327_v3, inf  ;;  %v1335_v28 = vand.u32 2147483648, %v1327_v3 }
 0x205   : > { %vm1334_vm6 = vcmp.eq.f32.partialorder %v1327_v3, 0.0 }
 0x211   : > { %v2817_v15 = vpop.eup %2816 }
 0x212   : > { %v1339_v16 = vsel %vm1337_vm4, %v2817_v15, 0.0  ;;  %v1331_v23 = vmul.f32 %v2817_v15, %v1327_v3 }
 0x213   : > { %v1346_v27 = vsel %vm1344_vm3, %v1339_v16, 0 }
 0x214   : > { %v1418_v38 = vand.u32 4294901760, %v1346_v27  ;;  %v1333_v42 = vsel %vm1332_vm5, %v1327_v3, %v1331_v23 }
 0x215   : > { %v1336_v50 = vsel %vm1334_vm6, %v1335_v28, %v1333_v42 }
 0x216   : > { %v1419_v51 = vsub.f32 %v1346_v27, %v1418_v38  ;;  %2723 = vmatmul.mubr.f32.vlgmr.msra.gmra.mxu1 %v1418_v38  ;;  %v1340_v53 = vadd.f32 1.0, %v1336_v50 }
 0x217   : > { %2731 = vmatpush3.msra.mxu1 %v1383_v19  ;;  %2732 = vmatprep.mubr.msk.f32.mxu1 %vm2883_vm0, %v2882_v2 }
 0x218   : > { %v1420_v58 = vand.u32 4294901760, %v1419_v51  ;;  %2740 = vmatprep.subr.mxu1 %v2882_v2  ;;  %2818 = vrcp.f32 %v1340_v53 }
 0x21a   : > { %2733 = vmatmul.mubr.f32.vlgmr.msra.gmra.mxu1 %v1420_v58  ;;  %v1421_v0 = vsub.f32 %v1419_v51, %v1420_v58 }
 0x21b   : > { %2741 = vmatpush3.msra.mxu1 %v1383_v19  ;;  %2742 = vmatprep.mubr.msk.f32.mxu1 %vm2883_vm0, %v2882_v2 }
 0x21c   : > { %v1422_v43 = vand.u32 4294901760, %v1421_v0  ;;  %2750 = vmatprep.subr.mxu1 %v2882_v2 }
 0x21e   : > { %2718 = vmatmul.mubr.f32.vlgmr.msra.gmra.mxu0 %v1422_v43  ;;  %2743 = vmatmul.mubr.f32.vlgmr.msra.gmra.mxu1 %v1418_v38 }
 0x21f   : > { %2726 = vmatpush3.msra.mxu0 %v3419_v22  ;;  %2727 = vmatprep.mubr.msk.f32.mxu0 %vm2883_vm0, %v2882_v2 }
 0x220   : > { %2735 = vmatprep.subr.mxu0 %v2882_v2  ;;  %2751 = vmatpush3.msra.mxu1 %v1916_v46 }
 0x221   : > { %2752 = vmatprep.mubr.msk.f32.mxu1 %vm2883_vm0, %v2882_v2  ;;  %2760 = vmatprep.subr.mxu1 %v2882_v2 }
 0x222   : > { %2728 = vmatmul.mubr.f32.vlgmr.msra.gmra.mxu0 %v1419_v51 }
 0x223   : > { %2736 = vmatpush3.msra.mxu0 %v1461_v24  ;;  %2737 = vmatprep.mubr.msk.f32.mxu0 %vm2883_vm0, %v2882_v2 }
 0x224   : > { %2745 = vmatprep.subr.mxu0 %v2882_v2 }
 0x225   : > { %v2819_v54 = vpop.eup %2818 }
 0x226   : > { %2738 = vmatmul.mubr.f32.vlgmr.msra.gmra.mxu0 %v1418_v38  ;;  %v1342_v56 = vmul.f32 %v2819_v54, %v1336_v50 }
 0x227   : > { %2746 = vmatpush3.msra.mxu0 %v1836_v9  ;;  %2747 = vmatprep.mubr.msk.f32.mxu0 %vm2883_vm0, %v2882_v2 }
 0x228   : > { %v1800_v60 = vsel %vm1344_vm3, %v1342_v56, 0  ;;  %2755 = vmatprep.subr.mxu0 %v2882_v2 }
 0x229   : > { %v1871_v61 = vand.u32 4294901760, %v1800_v60 }
 0x22b   : > { %v1872_v5 = vsub.f32 %v1800_v60, %v1871_v61  ;;  %2753 = vmatmul.mubr.f32.vlgmr.msra.gmra.mxu1 %v1871_v61 }
 0x22c   : > { %2761 = vmatpush3.msra.mxu1 %v1836_v9  ;;  %2762 = vmatprep.mubr.msk.f32.mxu1 %vm2883_vm0, %v2882_v2 }
 0x22d   : > { %v1873_v11 = vand.u32 4294901760, %v1872_v5  ;;  %2770 = vmatprep.subr.mxu1 %v2882_v2 }
 0x22f   : > { %2763 = vmatmul.mubr.f32.vlgmr.msra.gmra.mxu1 %v1873_v11  ;;  %v1874_v12 = vsub.f32 %v1872_v5, %v1873_v11 }
 0x230   : > { %2771 = vmatpush3.msra.mxu1 %v1836_v9  ;;  %2772 = vmatprep.mubr.msk.f32.mxu1 %vm2883_vm0, %v2882_v2 }
 0x231   : > { %v1875_v21 = vand.u32 4294901760, %v1874_v12 }
 0x233   : > { %2748 = vmatmul.mubr.f32.vlgmr.msra.gmra.mxu0 %v1875_v21  ;;  %2773 = vmatmul.mubr.f32.vlgmr.msra.gmra.mxu1 %v1871_v61 }
 0x234   : > { %2756 = vmatpush3.msra.mxu0 %v3431_v14  ;;  %2757 = vmatprep.mubr.msk.f32.mxu0 %vm2883_vm0, %v2882_v2 }
 0x235   : > { %2765 = vmatprep.subr.mxu0 %v2882_v2 }
 0x237   : > { %2758 = vmatmul.mubr.f32.vlgmr.msra.gmra.mxu0 %v1872_v5 }
 0x238   : > { %2766 = vmatpush3.msra.mxu0 %v1914_v39  ;;  %2767 = vmatprep.mubr.msk.f32.mxu0 %vm2883_vm0, %v2882_v2 }
 0x23b   : > { %2768 = vmatmul.mubr.f32.vlgmr.msra.gmra.mxu0 %v1871_v61 }
 0x2d6   : > { %v1500_v20 = vpop.f32.mrf.mxu1 }
 0x2d8   : > { %v2724_v31 = vpop.f32.mrf.mxu1 }
 0x2da   : > { %v1648_v33 = vpop.f32.mrf.mxu1 }
 0x2dc   : > { %v2734_v47 = vpop.f32.mrf.mxu1 }
 0x2de   : > { %v1424_v17 = vpop.f32.mrf.mxu0  ;;  %v1794_v62 = vpop.f32.mrf.mxu1 }
 0x2df   : > { %v1501_v22 = vadd.f32 %v1500_v20, %v1424_v17 }
 0x2e0   : > { %v2719_v32 = vpop.f32.mrf.mxu0  ;;  %v2744_v4 = vpop.f32.mrf.mxu1 }
 0x2e2   : > { %v1574_v8 = vpop.f32.mrf.mxu0 }
 0x2e3   : > { %v1575_v25 = vadd.f32 %v1574_v8, %v1501_v22 }
 0x2e4   : > { %v2729_v10 = vpop.f32.mrf.mxu0 }
 0x2e5   : > { %v1649_v29 = vadd.f32 %v1648_v33, %v1575_v25 }
 0x2e6   : > { %v1722_v13 = vpop.f32.mrf.mxu0 }
 0x2e7   : > { %v1723_v37 = vadd.f32 %v1722_v13, %v1649_v29 }
 0x2e8   : > { %v2739_v18 = vpop.f32.mrf.mxu0 }
 0x2e9   : > { %v1795_v48 = vadd.f32 %v1794_v62, %v1723_v37 }
 0x2eb   : > { %v1953_v19 = vpop.f32.mrf.mxu1  ;;  %v2251_v1 = vmul.f32 %v1795_v48, %v3244_v57 }
 0x2ed   : > { %v2754_v24 = vpop.f32.mrf.mxu1 }
 0x2ef   : > { %v2101_v26 = vpop.f32.mrf.mxu1 }
 0x2f1   : > { %v2764_v2 = vpop.f32.mrf.mxu1 }
 0x2f3   : > { %v1877_v30 = vpop.f32.mrf.mxu0  ;;  %v2247_v34 = vpop.f32.mrf.mxu1 }
 0x2f4   : > { %v1954_v40 = vadd.f32 %v1953_v19, %v1877_v30 }
 0x2f5   : > { %v2749_v35 = vpop.f32.mrf.mxu0  ;;  %v2774_v36 = vpop.f32.mrf.mxu1 }
 0x2f7   : > { %v2027_v41 = vpop.f32.mrf.mxu0 }
 0x2f8   : > { %v2028_v44 = vadd.f32 %v2027_v41, %v1954_v40 }
 0x2f9   : > { %v2759_v45 = vpop.f32.mrf.mxu0 }
 0x2fa   : > { %v2102_v49 = vadd.f32 %v2101_v26, %v2028_v44 }
 0x2fb   : > { %v2175_v52 = vpop.f32.mrf.mxu0 }
 0x2fc   : > { %v2176_v55 = vadd.f32 %v2175_v52, %v2102_v49 }
 0x2fd   : > { %v2769_v63 = vpop.f32.mrf.mxu0 }
 0x2fe   : > { %v2248_v3 = vadd.f32 %v2247_v34, %v2176_v55 }
 0x300   : > { %v2252_v6 = vadd.f32 %v2251_v1, %v2248_v3 }
 0x302   : > { %2253 = vst [vmem:[%s215_s25] sm:$0xff] %v2252_v6 }
 0x303   : > { %2833 = shalt.err (!%p2830_p3)
}
 0x304   : > { %s2834_s12 = scalar_lea.hbm %s2266_s7, 128  ;;  %s2838_s15 = scalar_lea.hbm %s3509_s5, 256 }
 0x305   : > { %p2835_p4 = scmp.ne.s32.totalorder %s2266_s7, %s2834_s12  ;;  %p2839_p9 = scmp.lt.s32.totalorder %s2266_s7, %s3509_s5 }
 0x306   : > { %p2840_p10 = scmp.lt.s32.totalorder %s2838_s15, %s2834_s12 }
 0x307   : > { %p2836_p7 = pnand %p2835_p4, %p2953_p5 }
 0x308   : > { %p2841_p11 = por %p2840_p10, %p2839_p9 }
 0x309   : > { %p2837_p8 = pneg %p2836_p7 }
 0x30b   : > { %p2842_p12 = pnand %p2841_p11, %p2837_p8 }
 0x30d   : > { %2845 = shalt.err (!%p2842_p12)
}
 0x30e   : > { %2775 = dma.vmem_to_hbm [thread:$0]  (%p2953_p5), %s2269_s26, 128, %s2266_s7, %s2255_s8  }
 0x30f PF: > { %p2781_p13 = scmp.ge.s32.totalorder %s2880_s21, 2  ;;  %s2280_s23 = sand.u32 1, %s2868_s18  }
 0x310   : > { %s2281_s25 = scalar_lea.sflag [#allocation3], %s2280_s23 }
 0x311   : > { %p2778_p0 = pnand %p2781_p13, %p2957_p6 }
 0x313   : > { %p2779_p1 = pneg %p2778_p0 }
 0x315   : > { %2863 = dma.done.wait (%p2779_p1), %s2281_s25, 128  }
 0x316   : > { %2865 = vsyncadd (%p2779_p1), %s2281_s25, 4294967168  ;;  %p15_p2 = scmp.ge.s32.totalorder %s2940_s24, 4   ;;  %s3518_s18 = smov %s2872_s19 }
 0x317   : > { %s3519_s19 = smov %s2876_s20  ;;  %s3520_s20 = smov %s2951_s27 }
 0x318   : > { %s3521_s21 = smov %s2940_s24  ;;  %17 = sbr.rel (!%p15_p2) target bundleno = 3 (0x3), region = 75 }
 0x31d   :  { %2286 = vsyncpa [#allocation3], 1 }
 0x31e   :  { %2288 = vsyncpa [#allocation3 + $0x1], 1 }

// kernel: tpu_custom_call.1
= control target key start
LH: loop header
LB: loop body
LE: loop exit
PB: predicated region body
PF: predicated region fallthrough
CT: control target
= control target key end

     0   :  { %10 = vsyncpa [#allocation3], 0  ;;  %s3504_s0 = inlined_call_operand.vmem [shape: f32[16,8], index: 0, kind: input, shape index: {}]   ;;  %s3505_s1 = inlined_call_operand.vmem [shape: f32[8,128], index: 1, kind: input, shape index: {}]   ;;  %s3506_s2 = inlined_call_operand.vmem [shape: f32[128,4], index: 2, kind: input, shape index: {}]   ;;  %s3507_s3 = inlined_call_operand.vmem [shape: f32[4,128], index: 3, kind: input, shape index: {}]   ;;  %s3508_s4 = inlined_call_operand.vmem [shape: f32[4,128], index: 4, kind: input, shape index: {}]   ;;  %s3509_s5 = inlined_call_operand.hbm [shape: f32[16,128], index: 5, kind: output, shape index: {}]  }
   0x1   :  { %12 = vsyncpa [#allocation3 + $0x1], 0  ;;  %s2915_s18 = smov 0   ;;  %s2917_s19 = smov 0  }
   0x2   :  { %s2919_s20 = smov 0   ;;  %s2921_s21 = smov 0  }
   0x3 LB: > { %s2936_s22 = sadd.s32 4294967295, %s2880_s21   ;;  %s2327_s23 = sadd.s32 4294967294, %s2880_s21   ;;  %s2880_s21 = sphi %s2921_s21, %s3521_s21   ;;  %s2876_s20 = sphi %s2919_s20, %s3520_s20   ;;  %s2872_s19 = sphi %s2917_s19, %s3519_s19   ;;  %s2868_s18 = sphi %s2915_s18, %s3518_s18  }
   0x4   : > { %s2940_s24 = sadd.s32 1, %s2880_s21   ;;  %s135_s25 = sadd.s32 1, %s2876_s20 }
   0x5   : > { %s132_s26 = ssub.s32 %s2880_s21, %s2940_s24  ;;  %p145_p0 = scmp.ne.s32.totalorder %s2876_s20, %s2872_s19 }
   0x6   : > { %p133_p1 = scmp.eq.s32.totalorder %s132_s26, 0  ;;  %p146_p2 = scmp.eq.s32.totalorder %s2936_s22, 1 }
   0x7   : > { %p151_p3 = scmp.ne.s32.totalorder %s2872_s19, %s2868_s18  ;;  %p152_p4 = scmp.eq.s32.totalorder %s2327_s23, 1 }
   0x8   : > { %s2951_s27 = scalar_select %p133_p1, %s2876_s20, %s135_s25  }
   0x9   : > { %p2953_p5 = por %p146_p2, %p145_p0  ;;  %p2957_p6 = por %p152_p4, %p151_p3 }
   0xa   : > { %p2330_p7 = scmp.ge.s32.totalorder %s2880_s21, 1  ;;  %p189_p8 = scmp.lt.s32.totalorder %s2880_s21, 3 }
   0xc   : > { %p190_p9 = pnand %p2330_p7, %p189_p8 }
   0xd   : > { %p216_p10 = scmp.lt.s32.totalorder (!%p190_p9), %s2936_s22, 1  ;;  %s213_s16 = sand.u32 (!%p190_p9), 1, %s2872_s19  }
   0xe   : > { %193 = sbr.rel (%p190_p9) target bundleno = 783 (0x30f), region = 40  ;;  %s2334_s23 = sshll.u32 (!%p190_p9), %s2936_s22, 7 }
   0xf   : > { %s2266_s7 = scalar_lea.hbm (!%p190_p9), %s3509_s5, %s2334_s23  ;;  %s2255_s8 = scalar_lea.sflag (!%p190_p9), [#allocation3], %s213_s16 }
  0x10   : > { %s2884_s10 = smov (!%p190_p9), [#allocation2]  }
  0x13   : > { %v221_v0 = vld [vmem:[%s3505_s1] sm:$0xff]  ;;  %v688_v1 = vld [vmem:[%s3506_s2 + $0x78] sm:$0xff]  ;;  %v2882_v2 = vmov 0.0   ;;  %v687_v5 = vld [vmem:[%s3506_s2 + $0x70] sm:$0xff]  ;;  %vm2883_vm0 = vmmov 0   ;;  %s217_s11 = scalar_select %p216_p10, %s2936_s22, 1 }
  0x14   : > { %2475 = vmatprep.subr.mxu0 %v2882_v2  ;;  %v257_v3 = vand.u32 4294901760, %v221_v0  ;;  %2480 = vmatprep.subr.mxu1 %v2882_v2  ;;  %v2972_v4 = vand.u32 4294901760, %v688_v1  ;;  %v686_v7 = vld [vmem:[%s3506_s2 + $0x68] sm:$0xff]  ;;  %vm222_vm1 = vcmask 64512   ;;  %v2988_v8 = vand.u32 4294901760, %v687_v5  ;;  %v685_v11 = vld [vmem:[%s3506_s2 + $0x60] sm:$0xff] }
  0x15   : > { %2477 = vmatprep.mubr.msk.f32.mxu0 %vm2883_vm0, %v2882_v2  ;;  %2482 = vmatprep.mubr.msk.f32.mxu1 %vm2883_vm0, %v2882_v2  ;;  %s2332_s14 = sshll.u32 %s217_s11, 3  ;;  %v3000_v13 = vand.u32 4294901760, %v686_v7  ;;  %v684_v16 = vld [vmem:[%s3506_s2 + $0x58] sm:$0xff]  ;;  %v3011_v19 = vand.u32 4294901760, %v685_v11  ;;  %v683_v20 = vld [vmem:[%s3506_s2 + $0x50] sm:$0xff]  ;;  %v682_v27 = vld [vmem:[%s3506_s2 + $0x48] sm:$0xff] }
  0x16   : > { %2476 = vmatpush3.msra.mxu0 %v257_v3  ;;  %v2982_v6 = vsub.f32 %v221_v0, %v257_v3  ;;  %s219_s17 = scalar_lea.vmem %s3504_s0, %s2332_s14  ;;  %v2995_v10 = vsub.f32 %v688_v1, %v2972_v4  ;;  %v3009_v18 = vsub.f32 %v687_v5, %v2988_v8  ;;  %v3020_v25 = vand.u32 4294901760, %v684_v16  ;;  %v681_v32 = vld [vmem:[%s3506_s2 + $0x40] sm:$0xff]  ;;  %v680_v62 = vld [vmem:[%s3506_s2 + $0x38] sm:$0xff]  ;;  %v679_v0 = vld [vmem:[%s3506_s2 + $0x30] sm:$0xff]  ;;  %s2824_s22 = sshll.u32 %s2884_s10, 4  ;;  %s2825_s22 = int_to_ptr.vmem [resolvable:$false] %s2824_s22 }
  0x17   : > { %2485 = vmatprep.subr.mxu0 %v2882_v2  ;;  %v220_v12 = vld [vmem:[%s219_s17] sm:$0xff]  ;;  %v3018_v24 = vsub.f32 %v686_v7, %v3000_v13  ;;  %v3022_v26 = vand.u32 4294901760, %v683_v20  ;;  %v3030_v30 = vsub.f32 %v685_v11, %v3011_v19  ;;  %v3045_v36 = vand.u32 4294901760, %v682_v27  ;;  %v678_v5 = vld [vmem:[%s3506_s2 + $0x28] sm:$0xff]  ;;  %s2331_s17 = sshll.u32 %s213_s16, 3  ;;  %s2826_s11 = scalar_lea.vmem %s2825_s22, 256 }
  0x18   : > { %v335_v9 = vand.u32 4294901760, %v2982_v6  ;;  %v224_v15 = vsel %vm222_vm1, %v220_v12, 0  ;;  %v783_v22 = vand.u32 4294901760, %v2995_v10  ;;  %v790_v29 = vand.u32 4294901760, %v3009_v18  ;;  %v677_v11 = vld [vmem:[%s3506_s2 + $0x20] sm:$0xff]  ;;  %s215_s25 = scalar_lea.vmem [#allocation2], %s2331_s17 }
  0x19   : > { %v292_v17 = vand.u32 4294901760, %v224_v15  ;;  %v797_v34 = vand.u32 4294901760, %v3018_v24  ;;  %v3043_v35 = vsub.f32 %v684_v16, %v3020_v25  ;;  %v3048_v37 = vsub.f32 %v683_v20, %v3022_v26  ;;  %s2268_s26 = sshll.u32 %s215_s25, 4  ;;  %s2269_s26 = int_to_ptr.vmem [resolvable:$true] %s2268_s26 }
  0x1a   : > { %v336_v14 = vsub.f32 %v2982_v6, %v335_v9  ;;  %v784_v31 = vsub.f32 %v2995_v10, %v783_v22  ;;  %v791_v39 = vsub.f32 %v3009_v18, %v790_v29  ;;  %v804_v40 = vand.u32 4294901760, %v3030_v30  ;;  %s2820_s9 = scalar_lea.vmem %s2269_s26, 128  ;;  %p2827_p0 = scmp.lt.s32.totalorder %s2269_s26, %s2825_s22 }
  0x1b   : > { %v293_v23 = vsub.f32 %v224_v15, %v292_v17  ;;  %v3054_v41 = vand.u32 4294901760, %v681_v32  ;;  %v798_v43 = vsub.f32 %v3018_v24, %v797_v34  ;;  %v811_v44 = vand.u32 4294901760, %v3043_v35  ;;  %p2821_p11 = scmp.ne.s32.totalorder %s2269_s26, %s2820_s9  ;;  %p2828_p1 = scmp.lt.s32.totalorder %s2826_s11, %s2820_s9 }
  0x1c   : > { %v337_v21 = vand.u32 4294901760, %v336_v14  ;;  %v785_v42 = vand.u32 4294901760, %v784_v31  ;;  %v3064_v45 = vsub.f32 %v682_v27, %v3045_v36  ;;  %v792_v46 = vand.u32 4294901760, %v791_v39  ;;  %v675_v31 = vld [vmem:[%s3506_s2 + $0x10] sm:$0xff] }
  0x1d   : > { %v294_v28 = vand.u32 4294901760, %v293_v23  ;;  %v805_v47 = vsub.f32 %v3030_v30, %v804_v40  ;;  %v818_v48 = vand.u32 4294901760, %v3048_v37  ;;  %v3075_v49 = vsub.f32 %v681_v32, %v3054_v41  ;;  %p2822_p12 = pnand %p2821_p11, %p2953_p5  ;;  %p2829_p2 = por %p2828_p1, %p2827_p0 }
  0x1e   : > { %2481 = vmatpush3.msra.mxu1 %v337_v21  ;;  %v799_v50 = vand.u32 4294901760, %v798_v43  ;;  %v812_v51 = vsub.f32 %v3043_v35, %v811_v44  ;;  %v825_v52 = vand.u32 4294901760, %v3064_v45  ;;  %v3127_v63 = vand.u32 4294901760, %v680_v62  ;;  %v674_v43 = vld [vmem:[%s3506_s2 + $0x8] sm:$0xff] }
  0x1f   : > { %2483 = vmatmul.mubr.f32.vlgmr.msra.gmra.mxu1 %v292_v17  ;;  %2490 = vmatprep.subr.mxu1 %v2882_v2  ;;  %v295_v33 = vsub.f32 %v293_v23, %v294_v28  ;;  %v806_v53 = vand.u32 4294901760, %v805_v47  ;;  %v819_v54 = vsub.f32 %v3048_v37, %v818_v48  ;;  %v832_v55 = vand.u32 4294901760, %v3075_v49  ;;  %p2823_p13 = pneg %p2822_p12 }
  0x20   : > { %2491 = vmatpush3.msra.mxu1 %v257_v3  ;;  %2492 = vmatprep.mubr.msk.f32.mxu1 %vm2883_vm0, %v2882_v2  ;;  %v813_v56 = vand.u32 4294901760, %v812_v51  ;;  %v826_v57 = vsub.f32 %v3064_v45, %v825_v52  ;;  %v3133_v1 = vsub.f32 %v680_v62, %v3127_v63  ;;  %v3160_v16 = vand.u32 4294901760, %v677_v11 }
  0x21   : > { %2500 = vmatprep.subr.mxu1 %v2882_v2  ;;  %v296_v38 = vand.u32 4294901760, %v295_v33  ;;  %v820_v58 = vand.u32 4294901760, %v819_v54  ;;  %v833_v59 = vsub.f32 %v3075_v49, %v832_v55  ;;  %v3185_v39 = vand.u32 4294901760, %v675_v31  ;;  %v673_v54 = vld [vmem:[%s3506_s2] sm:$0xff]  ;;  %p2830_p3 = pnand %p2829_p2, %p2823_p13 }
  0x22   : > { %v827_v60 = vand.u32 4294901760, %v826_v57  ;;  %v3172_v27 = vsub.f32 %v677_v11, %v3160_v16  ;;  %v3201_v51 = vand.u32 4294901760, %v674_v43  ;;  %vm1348_vm2 = vcmask 1043456  }
  0x23   : > { %2493 = vmatmul.mubr.f32.vlgmr.msra.gmra.mxu1 %v294_v28  ;;  %2478 = vmatmul.mubr.f32.vlgmr.msra.gmra.mxu0 %v296_v38  ;;  %v834_v61 = vand.u32 4294901760, %v833_v59  ;;  %v3214_v59 = vand.u32 4294901760, %v673_v54  ;;  %vm1344_vm3 = vcmask 31744  }
  0x24   : > { %2501 = vmatpush3.msra.mxu1 %v257_v3  ;;  %2502 = vmatprep.mubr.msk.f32.mxu1 %vm2883_vm0, %v2882_v2  ;;  %v3135_v3 = vand.u32 4294901760, %v679_v0  ;;  %v860_v38 = vand.u32 4294901760, %v3172_v27 }
  0x25   : > { %2540 = vmatprep.subr.mxu1 %v2882_v2  ;;  %2486 = vmatpush3.msra.mxu0 %v2982_v6  ;;  %v839_v6 = vand.u32 4294901760, %v3133_v1 }
  0x26   : > { %2487 = vmatprep.mubr.msk.f32.mxu0 %vm2883_vm0, %v2882_v2  ;;  %2495 = vmatprep.subr.mxu0 %v2882_v2  ;;  %v3144_v7 = vsub.f32 %v679_v0, %v3135_v3  ;;  %v861_v47 = vsub.f32 %v3172_v27, %v860_v38  ;;  %v3227_v0 = vsub.f32 %v673_v54, %v3214_v59 }
  0x27   : > { %2503 = vmatmul.mubr.f32.vlgmr.msra.gmra.mxu1 %v292_v17  ;;  %2488 = vmatmul.mubr.f32.vlgmr.msra.gmra.mxu0 %v293_v23  ;;  %v840_v12 = vsub.f32 %v3133_v1, %v839_v6 }
  0x28   : > { %2541 = vmatpush3.msra.mxu1 %v785_v42  ;;  %2572 = vmatprep.mubr.msk.f32.mxu1 %vm2883_vm0, %v2882_v2  ;;  %v846_v14 = vand.u32 4294901760, %v3144_v7 }
  0x29   : > { %2542 = vmatprep.subr.mxu1 %v2882_v2  ;;  %2496 = vmatpush3.msra.mxu0 %v335_v9  ;;  %v3146_v9 = vand.u32 4294901760, %v678_v5  ;;  %v841_v20 = vand.u32 4294901760, %v840_v12 }
  0x2a   : > { %2497 = vmatprep.mubr.msk.f32.mxu0 %vm2883_vm0, %v2882_v2  ;;  %2543 = vmatpush3.msra.mxu1 %v792_v46  ;;  %v847_v21 = vsub.f32 %v3144_v7, %v846_v14 }
  0x2b   : > { %2505 = vmatprep.subr.mxu0 %v2882_v2  ;;  %2544 = vmatprep.subr.mxu1 %v2882_v2  ;;  %v3158_v15 = vsub.f32 %v678_v5, %v3146_v9 }
  0x2c   : > { %2498 = vmatmul.mubr.f32.vlgmr.msra.gmra.mxu0 %v292_v17  ;;  %2545 = vmatpush3.msra.mxu1 %v799_v50  ;;  %v676_v17 = vld [vmem:[%s3506_s2 + $0x18] sm:$0xff]  ;;  %v848_v32 = vand.u32 4294901760, %v847_v21  ;;  %v3199_v50 = vsub.f32 %v675_v31, %v3185_v39 }
  0x2d   : > { %2546 = vmatprep.subr.mxu1 %v2882_v2  ;;  %2506 = vmatpush3.msra.mxu0 %v2972_v4  ;;  %v853_v23 = vand.u32 4294901760, %v3158_v15  ;;  %v3175_v28 = vand.u32 4294901760, %v676_v17 }
  0x2e   : > { %2547 = vmatpush3.msra.mxu1 %v806_v53  ;;  %2507 = vmatprep.subr.mxu0 %v2882_v2  ;;  %v3512_v57 = vand.u32 4294901760, %v3199_v50 }
  0x2f   : > { %2548 = vmatprep.subr.mxu1 %v2882_v2  ;;  %2508 = vmatpush3.msra.mxu0 %v2988_v8  ;;  %v854_v33 = vsub.f32 %v3158_v15, %v853_v23  ;;  %v3189_v42 = vsub.f32 %v676_v17, %v3175_v28  ;;  %v3510_v17 = vand.u32 4294901760, %v3227_v0 }
  0x30   : > { %2549 = vmatpush3.msra.mxu1 %v813_v56  ;;  %2509 = vmatprep.subr.mxu0 %v2882_v2  ;;  %v862_v56 = vand.u32 4294901760, %v861_v47 }
  0x31   : > { %2550 = vmatprep.subr.mxu1 %v2882_v2  ;;  %2510 = vmatpush3.msra.mxu0 %v3000_v13  ;;  %v855_v46 = vand.u32 4294901760, %v854_v33  ;;  %v867_v53 = vand.u32 4294901760, %v3189_v42  ;;  %v889_v21 = vsub.f32 %v3227_v0, %v3510_v17 }
  0x32   : > { %2551 = vmatpush3.msra.mxu1 %v820_v58  ;;  %2511 = vmatprep.subr.mxu0 %v2882_v2  ;;  %v3212_v58 = vsub.f32 %v674_v43, %v3201_v51 }
  0x33   : > { %2552 = vmatprep.subr.mxu1 %v2882_v2  ;;  %2512 = vmatpush3.msra.mxu0 %v3011_v19  ;;  %v890_v31 = vand.u32 4294901760, %v889_v21 }
  0x34   : > { %2553 = vmatpush3.msra.mxu1 %v827_v60  ;;  %2513 = vmatprep.subr.mxu0 %v2882_v2  ;;  %v868_v60 = vsub.f32 %v3189_v42, %v867_v53  ;;  %v3511_v62 = vand.u32 4294901760, %v3212_v58 }
  0x35   : > { %2554 = vmatprep.subr.mxu1 %v2882_v2  ;;  %2514 = vmatpush3.msra.mxu0 %v3020_v25 }
  0x36   : > { %2555 = vmatpush3.msra.mxu1 %v834_v61  ;;  %2515 = vmatprep.subr.mxu0 %v2882_v2  ;;  %v875_v61 = vsub.f32 %v3199_v50, %v3512_v57  ;;  %v869_v5 = vand.u32 4294901760, %v868_v60  ;;  %v882_v12 = vsub.f32 %v3212_v58, %v3511_v62 }
  0x37   : > { %2556 = vmatprep.subr.mxu1 %v2882_v2  ;;  %2516 = vmatpush3.msra.mxu0 %v3022_v26 }
  0x38   : > { %2517 = vmatprep.subr.mxu0 %v2882_v2  ;;  %2537 = vmatprep.mubr.msk.f32.mxu0 %vm2883_vm0, %v2882_v2  ;;  %v876_v11 = vand.u32 4294901760, %v875_v61 }
  0x39   : > { %2518 = vmatpush3.msra.mxu0 %v3045_v36  ;;  %2557 = vmatpush3.msra.mxu1 %v841_v20  ;;  %v883_v20 = vand.u32 4294901760, %v882_v12 }
  0x3a   : > { %2519 = vmatprep.subr.mxu0 %v2882_v2  ;;  %2558 = vmatprep.subr.mxu1 %v2882_v2 }
  0x3b   : > { %2520 = vmatpush3.msra.mxu0 %v3054_v41  ;;  %2559 = vmatpush3.msra.mxu1 %v848_v32 }
  0x3c   : > { %2521 = vmatprep.subr.mxu0 %v2882_v2  ;;  %2560 = vmatprep.subr.mxu1 %v2882_v2 }
  0x3d   : > { %2522 = vmatpush3.msra.mxu0 %v3127_v63  ;;  %2561 = vmatpush3.msra.mxu1 %v855_v46 }
  0x3e   : > { %2523 = vmatprep.subr.mxu0 %v2882_v2  ;;  %2562 = vmatprep.subr.mxu1 %v2882_v2 }
  0x3f   : > { %2524 = vmatpush3.msra.mxu0 %v3135_v3  ;;  %2563 = vmatpush3.msra.mxu1 %v862_v56 }
  0x40   : > { %2525 = vmatprep.subr.mxu0 %v2882_v2  ;;  %2564 = vmatprep.subr.mxu1 %v2882_v2 }
  0x41   : > { %2526 = vmatpush3.msra.mxu0 %v3146_v9  ;;  %2565 = vmatpush3.msra.mxu1 %v869_v5 }
  0x42   : > { %2527 = vmatprep.subr.mxu0 %v2882_v2  ;;  %2566 = vmatprep.subr.mxu1 %v2882_v2 }
  0x43   : > { %2528 = vmatpush3.msra.mxu0 %v3160_v16  ;;  %2567 = vmatpush3.msra.mxu1 %v876_v11 }
  0x44   : > { %2529 = vmatprep.subr.mxu0 %v2882_v2  ;;  %2568 = vmatprep.subr.mxu1 %v2882_v2 }
  0x45   : > { %2530 = vmatpush3.msra.mxu0 %v3175_v28  ;;  %2569 = vmatpush3.msra.mxu1 %v883_v20 }
  0x46   : > { %2531 = vmatprep.subr.mxu0 %v2882_v2  ;;  %2570 = vmatprep.subr.mxu1 %v2882_v2 }
  0x47   : > { %2532 = vmatpush3.msra.mxu0 %v3185_v39  ;;  %2571 = vmatpush3.msra.mxu1 %v890_v31 }
  0x48   : > { %2533 = vmatprep.subr.mxu0 %v2882_v2  ;;  %2610 = vmatprep.subr.mxu1 %v2882_v2 }
  0x49   : > { %2534 = vmatpush3.msra.mxu0 %v3201_v51 }
  0x4a   : > { %2535 = vmatprep.subr.mxu0 %v2882_v2 }
  0x4b   : > { %2536 = vmatpush3.msra.mxu0 %v3214_v59 }
  0x4c   : > { %2575 = vmatprep.subr.mxu0 %v2882_v2 }
  0xdf   : > { %v374_v32 = vpop.f32.mrf.mxu1 }
  0xe1   : > { %v2484_v33 = vpop.f32.mrf.mxu1 }
  0xe3   : > { %v522_v43 = vpop.f32.mrf.mxu1  ;;  %v298_v46 = vpop.f32.mrf.mxu0 }
  0xe4   : > { %v375_v60 = vadd.f32 %v374_v32, %v298_v46 }
  0xe5   : > { %v2494_v47 = vpop.f32.mrf.mxu1  ;;  %v2479_v54 = vpop.f32.mrf.mxu0 }
  0xe7   : > { %v668_v56 = vpop.f32.mrf.mxu1  ;;  %v448_v61 = vpop.f32.mrf.mxu0 }
  0xe8   : > { %v449_v11 = vadd.f32 %v448_v61, %v375_v60 }
  0xe9   : > { %v2504_v5 = vpop.f32.mrf.mxu1  ;;  %v2489_v12 = vpop.f32.mrf.mxu0 }
  0xea   : > { %v523_v17 = vadd.f32 %v522_v43, %v449_v11 }
  0xec   : > { %v596_v21 = vpop.f32.mrf.mxu0 }
  0xed   : > { %v597_v20 = vadd.f32 %v596_v21, %v523_v17 }
  0xee   : > { %v2499_v62 = vpop.f32.mrf.mxu0 }
  0xef   : > { %v3244_v57 = vadd.f32 %v668_v56, %v597_v20 }
  0xf1   : > { %v672_v31 = vmul.f32 %v3244_v57, %v3244_v57 }
  0xf3   : > { %v3248_v33 = vand.u32 4294901760, %v672_v31 }
  0xf5   : > { %v3251_v47 = vsub.f32 %v672_v31, %v3248_v33  ;;  %2573 = vmatmul.mubr.f32.vlgmr.msra.gmra.mxu1 %v3248_v33 }
  0xf6   : > { %2611 = vmatpush3.msra.mxu1 %v2972_v4  ;;  %2642 = vmatprep.mubr.msk.f32.mxu1 %vm2883_vm0, %v2882_v2 }
  0xf7   : > { %v772_v17 = vand.u32 4294901760, %v3251_v47  ;;  %2612 = vmatprep.subr.mxu1 %v2882_v2 }
  0xf8   : > { %2613 = vmatpush3.msra.mxu1 %v2988_v8 }
  0xf9   : > { %2614 = vmatprep.subr.mxu1 %v2882_v2  ;;  %v773_v62 = vsub.f32 %v3251_v47, %v772_v17 }
  0xfa   : > { %2615 = vmatpush3.msra.mxu1 %v3000_v13 }
  0xfb   : > { %2616 = vmatprep.subr.mxu1 %v2882_v2  ;;  %v774_v32 = vand.u32 4294901760, %v773_v62 }
  0xfc   : > { %2617 = vmatpush3.msra.mxu1 %v3011_v19 }
  0xfd   : > { %2618 = vmatprep.subr.mxu1 %v2882_v2  ;;  %2538 = vmatmul.mubr.f32.vlgmr.msra.gmra.mxu0 %v774_v32 }
  0xfe   : > { %2576 = vmatpush3.msra.mxu0 %v2995_v10  ;;  %2619 = vmatpush3.msra.mxu1 %v3020_v25  ;;  %v3517_v10 = vand.u32 4294901760, %v3227_v0 }
  0xff   : > { %2577 = vmatprep.subr.mxu0 %v2882_v2  ;;  %2620 = vmatprep.subr.mxu1 %v2882_v2 }
 0x100   : > { %2578 = vmatpush3.msra.mxu0 %v3009_v18  ;;  %2621 = vmatpush3.msra.mxu1 %v3022_v26 }
 0x101   : > { %2579 = vmatprep.subr.mxu0 %v2882_v2  ;;  %2622 = vmatprep.subr.mxu1 %v2882_v2 }
 0x102   : > { %2580 = vmatpush3.msra.mxu0 %v3018_v24  ;;  %2623 = vmatpush3.msra.mxu1 %v3045_v36 }
 0x103   : > { %2581 = vmatprep.subr.mxu0 %v2882_v2  ;;  %2624 = vmatprep.subr.mxu1 %v2882_v2 }
 0x104   : > { %2582 = vmatpush3.msra.mxu0 %v3030_v30  ;;  %2625 = vmatpush3.msra.mxu1 %v3054_v41 }
 0x105   : > { %2583 = vmatprep.subr.mxu0 %v2882_v2  ;;  %2626 = vmatprep.subr.mxu1 %v2882_v2 }
 0x106   : > { %2584 = vmatpush3.msra.mxu0 %v3043_v35  ;;  %2627 = vmatpush3.msra.mxu1 %v3127_v63 }
 0x107   : > { %2585 = vmatprep.subr.mxu0 %v2882_v2  ;;  %2628 = vmatprep.subr.mxu1 %v2882_v2 }
 0x108   : > { %2586 = vmatpush3.msra.mxu0 %v3048_v37  ;;  %2629 = vmatpush3.msra.mxu1 %v3135_v3 }
 0x109   : > { %2587 = vmatprep.subr.mxu0 %v2882_v2  ;;  %2630 = vmatprep.subr.mxu1 %v2882_v2 }
 0x10a   : > { %2588 = vmatpush3.msra.mxu0 %v3064_v45  ;;  %2631 = vmatpush3.msra.mxu1 %v3146_v9 }
 0x10b   : > { %2589 = vmatprep.subr.mxu0 %v2882_v2  ;;  %2632 = vmatprep.subr.mxu1 %v2882_v2 }
 0x10c   : > { %2590 = vmatpush3.msra.mxu0 %v3075_v49  ;;  %2633 = vmatpush3.msra.mxu1 %v3160_v16 }
 0x10d   : > { %2591 = vmatprep.subr.mxu0 %v2882_v2  ;;  %2634 = vmatprep.subr.mxu1 %v2882_v2 }
 0x10e   : > { %2592 = vmatpush3.msra.mxu0 %v3133_v1  ;;  %2635 = vmatpush3.msra.mxu1 %v3175_v28 }
 0x10f   : > { %2593 = vmatprep.subr.mxu0 %v2882_v2  ;;  %2636 = vmatprep.subr.mxu1 %v2882_v2 }
 0x110   : > { %2594 = vmatpush3.msra.mxu0 %v3144_v7  ;;  %2637 = vmatpush3.msra.mxu1 %v3185_v39 }
 0x111   : > { %2595 = vmatprep.subr.mxu0 %v2882_v2  ;;  %2638 = vmatprep.subr.mxu1 %v2882_v2 }
 0x112   : > { %2596 = vmatpush3.msra.mxu0 %v3158_v15  ;;  %2639 = vmatpush3.msra.mxu1 %v3201_v51 }
 0x113   : > { %2597 = vmatprep.subr.mxu0 %v2882_v2  ;;  %2640 = vmatprep.subr.mxu1 %v2882_v2 }
 0x114   : > { %2598 = vmatpush3.msra.mxu0 %v3172_v27  ;;  %2641 = vmatpush3.msra.mxu1 %v3214_v59 }
 0x115   : > { %2599 = vmatprep.subr.mxu0 %v2882_v2  ;;  %2643 = vmatmul.mubr.f32.vlgmr.msra.gmra.mxu1 %v772_v17 }
 0x116   : > { %2680 = vmatprep.subr.mxu1 %v2882_v2  ;;  %2600 = vmatpush3.msra.mxu0 %v3189_v42 }
 0x117   : > { %2681 = vmatpush3.msra.mxu1 %v2972_v4  ;;  %2601 = vmatprep.subr.mxu0 %v2882_v2  ;;  %v3515_v4 = vand.u32 4294901760, %v3199_v50 }
 0x118   : > { %2682 = vmatprep.subr.mxu1 %v2882_v2  ;;  %2602 = vmatpush3.msra.mxu0 %v3199_v50 }
 0x119   : > { %2683 = vmatpush3.msra.mxu1 %v2988_v8  ;;  %2603 = vmatprep.subr.mxu0 %v2882_v2  ;;  %v3516_v8 = vand.u32 4294901760, %v3212_v58 }
 0x11a   : > { %2684 = vmatprep.subr.mxu1 %v2882_v2  ;;  %2604 = vmatpush3.msra.mxu0 %v3212_v58 }
 0x11b   : > { %2685 = vmatpush3.msra.mxu1 %v3000_v13  ;;  %2605 = vmatprep.subr.mxu0 %v2882_v2  ;;  %v1343_v13 = vld [vmem:[%s3507_s3] sm:$0xf] }
 0x11c   : > { %2686 = vmatprep.subr.mxu1 %v2882_v2  ;;  %2606 = vmatpush3.msra.mxu0 %v3227_v0  ;;  %v1350_v18 = vsel %vm1348_vm2, %v1343_v13, 0 }
 0x11d   : > { %2607 = vmatprep.mubr.msk.f32.mxu0 %vm2883_vm0, %v2882_v2  ;;  %2687 = vmatpush3.msra.mxu1 %v3011_v19  ;;  %v1383_v19 = vand.u32 4294901760, %v1350_v18 }
 0x11e   : > { %2608 = vmatmul.mubr.f32.vlgmr.msra.gmra.mxu0 %v3251_v47  ;;  %2645 = vmatprep.subr.mxu0 %v2882_v2 }
 0x11f   : > { %2688 = vmatprep.subr.mxu1 %v2882_v2  ;;  %2646 = vmatpush3.msra.mxu0 %v783_v22  ;;  %v3419_v22 = vsub.f32 %v1350_v18, %v1383_v19 }
 0x120   : > { %2689 = vmatpush3.msra.mxu1 %v3020_v25  ;;  %2647 = vmatprep.subr.mxu0 %v2882_v2 }
 0x121   : > { %2690 = vmatprep.subr.mxu1 %v2882_v2  ;;  %2648 = vmatpush3.msra.mxu0 %v790_v29  ;;  %v1461_v24 = vand.u32 4294901760, %v3419_v22 }
 0x122   : > { %2691 = vmatpush3.msra.mxu1 %v3022_v26  ;;  %2649 = vmatprep.subr.mxu0 %v2882_v2 }
 0x123   : > { %2692 = vmatprep.subr.mxu1 %v2882_v2  ;;  %2650 = vmatpush3.msra.mxu0 %v797_v34  ;;  %v1462_v25 = vsub.f32 %v3419_v22, %v1461_v24 }
 0x124   : > { %2693 = vmatpush3.msra.mxu1 %v3045_v36  ;;  %2651 = vmatprep.subr.mxu0 %v2882_v2 }
 0x125   : > { %2694 = vmatprep.subr.mxu1 %v2882_v2  ;;  %2652 = vmatpush3.msra.mxu0 %v804_v40  ;;  %v1463_v26 = vand.u32 4294901760, %v1462_v25 }
 0x126   : > { %2695 = vmatpush3.msra.mxu1 %v3054_v41  ;;  %2653 = vmatprep.subr.mxu0 %v2882_v2 }
 0x127   : > { %2696 = vmatprep.subr.mxu1 %v2882_v2  ;;  %2654 = vmatpush3.msra.mxu0 %v811_v44 }
 0x128   : > { %2697 = vmatpush3.msra.mxu1 %v3127_v63  ;;  %2655 = vmatprep.subr.mxu0 %v2882_v2 }
 0x129   : > { %2698 = vmatprep.subr.mxu1 %v2882_v2  ;;  %2656 = vmatpush3.msra.mxu0 %v818_v48 }
 0x12a   : > { %2699 = vmatpush3.msra.mxu1 %v3135_v3  ;;  %2657 = vmatprep.subr.mxu0 %v2882_v2 }
 0x12b   : > { %2700 = vmatprep.subr.mxu1 %v2882_v2  ;;  %2658 = vmatpush3.msra.mxu0 %v825_v52 }
 0x12c   : > { %2701 = vmatpush3.msra.mxu1 %v3146_v9  ;;  %2659 = vmatprep.subr.mxu0 %v2882_v2 }
 0x12d   : > { %2702 = vmatprep.subr.mxu1 %v2882_v2  ;;  %2660 = vmatpush3.msra.mxu0 %v832_v55 }
 0x12e   : > { %2703 = vmatpush3.msra.mxu1 %v3160_v16  ;;  %2661 = vmatprep.subr.mxu0 %v2882_v2 }
 0x12f   : > { %2704 = vmatprep.subr.mxu1 %v2882_v2  ;;  %2662 = vmatpush3.msra.mxu0 %v839_v6  ;;  %v1798_v6 = vld [vmem:[%s3508_s4] sm:$0xf] }
 0x130   : > { %2705 = vmatpush3.msra.mxu1 %v3175_v28  ;;  %2663 = vmatprep.subr.mxu0 %v2882_v2  ;;  %v1803_v7 = vsel %vm1348_vm2, %v1798_v6, 0 }
 0x131   : > { %2706 = vmatprep.subr.mxu1 %v2882_v2  ;;  %2664 = vmatpush3.msra.mxu0 %v846_v14  ;;  %v1836_v9 = vand.u32 4294901760, %v1803_v7 }
 0x132   : > { %2707 = vmatpush3.msra.mxu1 %v3185_v39  ;;  %2665 = vmatprep.subr.mxu0 %v2882_v2 }
 0x133   : > { %2708 = vmatprep.subr.mxu1 %v2882_v2  ;;  %2666 = vmatpush3.msra.mxu0 %v853_v23  ;;  %v3431_v14 = vsub.f32 %v1803_v7, %v1836_v9 }
 0x134   : > { %2709 = vmatpush3.msra.mxu1 %v3201_v51  ;;  %2667 = vmatprep.subr.mxu0 %v2882_v2 }
 0x135   : > { %2710 = vmatprep.subr.mxu1 %v2882_v2  ;;  %2668 = vmatpush3.msra.mxu0 %v860_v38  ;;  %v1914_v39 = vand.u32 4294901760, %v3431_v14 }
 0x136   : > { %2711 = vmatpush3.msra.mxu1 %v3214_v59  ;;  %2712 = vmatprep.mubr.msk.f32.mxu1 %vm2883_vm0, %v2882_v2 }
 0x137   : > { %2669 = vmatprep.subr.mxu0 %v2882_v2  ;;  %2713 = vmatmul.mubr.f32.vlgmr.msra.gmra.mxu1 %v3248_v33  ;;  %v1915_v59 = vsub.f32 %v3431_v14, %v1914_v39 }
 0x138   : > { %2670 = vmatpush3.msra.mxu0 %v867_v53  ;;  %2677 = vmatprep.mubr.msk.f32.mxu0 %vm2883_vm0, %v2882_v2 }
 0x139   : > { %2671 = vmatprep.subr.mxu0 %v2882_v2  ;;  %2720 = vmatprep.subr.mxu1 %v2882_v2  ;;  %v1916_v46 = vand.u32 4294901760, %v1915_v59 }
 0x13a   : > { %2672 = vmatpush3.msra.mxu0 %v3515_v4  ;;  %2722 = vmatprep.mubr.msk.f32.mxu1 %vm2883_vm0, %v2882_v2 }
 0x13b   : > { %2673 = vmatprep.subr.mxu0 %v2882_v2  ;;  %2721 = vmatpush3.msra.mxu1 %v1463_v26 }
 0x13c   : > { %2674 = vmatpush3.msra.mxu0 %v3516_v8  ;;  %2730 = vmatprep.subr.mxu1 %v2882_v2 }
 0x13d   : > { %2675 = vmatprep.subr.mxu0 %v2882_v2 }
 0x13e   : > { %2676 = vmatpush3.msra.mxu0 %v3517_v10 }
 0x13f   : > { %2678 = vmatmul.mubr.f32.vlgmr.msra.gmra.mxu0 %v3248_v33  ;;  %2715 = vmatprep.subr.mxu0 %v2882_v2 }
 0x140   : > { %2717 = vmatprep.mubr.msk.f32.mxu0 %vm2883_vm0, %v2882_v2  ;;  %2716 = vmatpush3.msra.mxu0 %v1383_v19 }
 0x141   : > { %2725 = vmatprep.subr.mxu0 %v2882_v2 }
 0x1b5   : > { %v927_v29 = vpop.f32.mrf.mxu1 }
 0x1b7   : > { %v2574_v30 = vpop.f32.mrf.mxu1 }
 0x1bd   : > { %v776_v34 = vpop.f32.mrf.mxu0 }
 0x1be   : > { %v928_v45 = vadd.f32 %v927_v29, %v776_v34 }
 0x1bf   : > { %v2539_v35 = vpop.f32.mrf.mxu0 }
 0x1d5   : > { %v1120_v36 = vpop.f32.mrf.mxu1 }
 0x1d7   : > { %v2644_v37 = vpop.f32.mrf.mxu1 }
 0x1de   : > { %v1031_v40 = vpop.f32.mrf.mxu0 }
 0x1df   : > { %v1032_v49 = vadd.f32 %v1031_v40, %v928_v45 }
 0x1e0   : > { %v2609_v41 = vpop.f32.mrf.mxu0 }
 0x1e1   : > { %v1121_v52 = vadd.f32 %v1120_v36, %v1032_v49 }
 0x1f7   : > { %v1326_v44 = vpop.f32.mrf.mxu1 }
 0x1f9   : > { %v2714_v48 = vpop.f32.mrf.mxu1 }
 0x1ff   : > { %v1239_v55 = vpop.f32.mrf.mxu0 }
 0x200   : > { %v1240_v63 = vadd.f32 %v1239_v55, %v1121_v52 }
 0x201   : > { %v2679_v1 = vpop.f32.mrf.mxu0 }
 0x202   : > { %v1327_v3 = vadd.f32 %v1326_v44, %v1240_v63 }
 0x204   : > { %2816 = vrsqrt.f32 %v1327_v3  ;;  %vm1337_vm4 = vcmp.gt.f32.partialorder %v1327_v3, 0.0  ;;  %vm1332_vm5 = vcmp.eq.f32.partialorder %v1327_v3, inf  ;;  %v1335_v28 = vand.u32 2147483648, %v1327_v3 }
 0x205   : > { %vm1334_vm6 = vcmp.eq.f32.partialorder %v1327_v3, 0.0 }
 0x211   : > { %v2817_v15 = vpop.eup %2816 }
 0x212   : > { %v1339_v16 = vsel %vm1337_vm4, %v2817_v15, 0.0  ;;  %v1331_v23 = vmul.f32 %v2817_v15, %v1327_v3 }
 0x213   : > { %v1346_v27 = vsel %vm1344_vm3, %v1339_v16, 0 }
 0x214   : > { %v1418_v38 = vand.u32 4294901760, %v1346_v27  ;;  %v1333_v42 = vsel %vm1332_vm5, %v1327_v3, %v1331_v23 }
 0x215   : > { %v1336_v50 = vsel %vm1334_vm6, %v1335_v28, %v1333_v42 }
 0x216   : > { %v1419_v51 = vsub.f32 %v1346_v27, %v1418_v38  ;;  %2723 = vmatmul.mubr.f32.vlgmr.msra.gmra.mxu1 %v1418_v38  ;;  %v1340_v53 = vadd.f32 1.0, %v1336_v50 }
 0x217   : > { %2731 = vmatpush3.msra.mxu1 %v1383_v19  ;;  %2732 = vmatprep.mubr.msk.f32.mxu1 %vm2883_vm0, %v2882_v2 }
 0x218   : > { %v1420_v58 = vand.u32 4294901760, %v1419_v51  ;;  %2740 = vmatprep.subr.mxu1 %v2882_v2  ;;  %2818 = vrcp.f32 %v1340_v53 }
 0x21a   : > { %2733 = vmatmul.mubr.f32.vlgmr.msra.gmra.mxu1 %v1420_v58  ;;  %v1421_v0 = vsub.f32 %v1419_v51, %v1420_v58 }
 0x21b   : > { %2741 = vmatpush3.msra.mxu1 %v1383_v19  ;;  %2742 = vmatprep.mubr.msk.f32.mxu1 %vm2883_vm0, %v2882_v2 }
 0x21c   : > { %v1422_v43 = vand.u32 4294901760, %v1421_v0  ;;  %2750 = vmatprep.subr.mxu1 %v2882_v2 }
 0x21e   : > { %2718 = vmatmul.mubr.f32.vlgmr.msra.gmra.mxu0 %v1422_v43  ;;  %2743 = vmatmul.mubr.f32.vlgmr.msra.gmra.mxu1 %v1418_v38 }
 0x21f   : > { %2726 = vmatpush3.msra.mxu0 %v3419_v22  ;;  %2727 = vmatprep.mubr.msk.f32.mxu0 %vm2883_vm0, %v2882_v2 }
 0x220   : > { %2735 = vmatprep.subr.mxu0 %v2882_v2  ;;  %2751 = vmatpush3.msra.mxu1 %v1916_v46 }
 0x221   : > { %2752 = vmatprep.mubr.msk.f32.mxu1 %vm2883_vm0, %v2882_v2  ;;  %2760 = vmatprep.subr.mxu1 %v2882_v2 }
 0x222   : > { %2728 = vmatmul.mubr.f32.vlgmr.msra.gmra.mxu0 %v1419_v51 }
 0x223   : > { %2736 = vmatpush3.msra.mxu0 %v1461_v24  ;;  %2737 = vmatprep.mubr.msk.f32.mxu0 %vm2883_vm0, %v2882_v2 }
 0x224   : > { %2745 = vmatprep.subr.mxu0 %v2882_v2 }
 0x225   : > { %v2819_v54 = vpop.eup %2818 }
 0x226   : > { %2738 = vmatmul.mubr.f32.vlgmr.msra.gmra.mxu0 %v1418_v38  ;;  %v1342_v56 = vmul.f32 %v2819_v54, %v1336_v50 }
 0x227   : > { %2746 = vmatpush3.msra.mxu0 %v1836_v9  ;;  %2747 = vmatprep.mubr.msk.f32.mxu0 %vm2883_vm0, %v2882_v2 }
 0x228   : > { %v1800_v60 = vsel %vm1344_vm3, %v1342_v56, 0  ;;  %2755 = vmatprep.subr.mxu0 %v2882_v2 }
 0x229   : > { %v1871_v61 = vand.u32 4294901760, %v1800_v60 }
 0x22b   : > { %v1872_v5 = vsub.f32 %v1800_v60, %v1871_v61  ;;  %2753 = vmatmul.mubr.f32.vlgmr.msra.gmra.mxu1 %v1871_v61 }
 0x22c   : > { %2761 = vmatpush3.msra.mxu1 %v1836_v9  ;;  %2762 = vmatprep.mubr.msk.f32.mxu1 %vm2883_vm0, %v2882_v2 }
 0x22d   : > { %v1873_v11 = vand.u32 4294901760, %v1872_v5  ;;  %2770 = vmatprep.subr.mxu1 %v2882_v2 }
 0x22f   : > { %2763 = vmatmul.mubr.f32.vlgmr.msra.gmra.mxu1 %v1873_v11  ;;  %v1874_v12 = vsub.f32 %v1872_v5, %v1873_v11 }
 0x230   : > { %2771 = vmatpush3.msra.mxu1 %v1836_v9  ;;  %2772 = vmatprep.mubr.msk.f32.mxu1 %vm2883_vm0, %v2882_v2 }
 0x231   : > { %v1875_v21 = vand.u32 4294901760, %v1874_v12 }
 0x233   : > { %2748 = vmatmul.mubr.f32.vlgmr.msra.gmra.mxu0 %v1875_v21  ;;  %2773 = vmatmul.mubr.f32.vlgmr.msra.gmra.mxu1 %v1871_v61 }
 0x234   : > { %2756 = vmatpush3.msra.mxu0 %v3431_v14  ;;  %2757 = vmatprep.mubr.msk.f32.mxu0 %vm2883_vm0, %v2882_v2 }
 0x235   : > { %2765 = vmatprep.subr.mxu0 %v2882_v2 }
 0x237   : > { %2758 = vmatmul.mubr.f32.vlgmr.msra.gmra.mxu0 %v1872_v5 }
 0x238   : > { %2766 = vmatpush3.msra.mxu0 %v1914_v39  ;;  %2767 = vmatprep.mubr.msk.f32.mxu0 %vm2883_vm0, %v2882_v2 }
 0x23b   : > { %2768 = vmatmul.mubr.f32.vlgmr.msra.gmra.mxu0 %v1871_v61 }
 0x2d6   : > { %v1500_v20 = vpop.f32.mrf.mxu1 }
 0x2d8   : > { %v2724_v31 = vpop.f32.mrf.mxu1 }
 0x2da   : > { %v1648_v33 = vpop.f32.mrf.mxu1 }
 0x2dc   : > { %v2734_v47 = vpop.f32.mrf.mxu1 }
 0x2de   : > { %v1424_v17 = vpop.f32.mrf.mxu0  ;;  %v1794_v62 = vpop.f32.mrf.mxu1 }
 0x2df   : > { %v1501_v22 = vadd.f32 %v1500_v20, %v1424_v17 }
 0x2e0   : > { %v2719_v32 = vpop.f32.mrf.mxu0  ;;  %v2744_v4 = vpop.f32.mrf.mxu1 }
 0x2e2   : > { %v1574_v8 = vpop.f32.mrf.mxu0 }
 0x2e3   : > { %v1575_v25 = vadd.f32 %v1574_v8, %v1501_v22 }
 0x2e4   : > { %v2729_v10 = vpop.f32.mrf.mxu0 }
 0x2e5   : > { %v1649_v29 = vadd.f32 %v1648_v33, %v1575_v25 }
 0x2e6   : > { %v1722_v13 = vpop.f32.mrf.mxu0 }
 0x2e7   : > { %v1723_v37 = vadd.f32 %v1722_v13, %v1649_v29 }
 0x2e8   : > { %v2739_v18 = vpop.f32.mrf.mxu0 }
 0x2e9   : > { %v1795_v48 = vadd.f32 %v1794_v62, %v1723_v37 }
 0x2eb   : > { %v1953_v19 = vpop.f32.mrf.mxu1  ;;  %v2251_v1 = vmul.f32 %v1795_v48, %v3244_v57 }
 0x2ed   : > { %v2754_v24 = vpop.f32.mrf.mxu1 }
 0x2ef   : > { %v2101_v26 = vpop.f32.mrf.mxu1 }
 0x2f1   : > { %v2764_v2 = vpop.f32.mrf.mxu1 }
 0x2f3   : > { %v1877_v30 = vpop.f32.mrf.mxu0  ;;  %v2247_v34 = vpop.f32.mrf.mxu1 }
 0x2f4   : > { %v1954_v40 = vadd.f32 %v1953_v19, %v1877_v30 }
 0x2f5   : > { %v2749_v35 = vpop.f32.mrf.mxu0  ;;  %v2774_v36 = vpop.f32.mrf.mxu1 }
 0x2f7   : > { %v2027_v41 = vpop.f32.mrf.mxu0 }
 0x2f8   : > { %v2028_v44 = vadd.f32 %v2027_v41, %v1954_v40 }
 0x2f9   : > { %v2759_v45 = vpop.f32.mrf.mxu0 }
 0x2fa   : > { %v2102_v49 = vadd.f32 %v2101_v26, %v2028_v44 }
 0x2fb   : > { %v2175_v52 = vpop.f32.mrf.mxu0 }
 0x2fc   : > { %v2176_v55 = vadd.f32 %v2175_v52, %v2102_v49 }
 0x2fd   : > { %v2769_v63 = vpop.f32.mrf.mxu0 }
 0x2fe   : > { %v2248_v3 = vadd.f32 %v2247_v34, %v2176_v55 }
 0x300   : > { %v2252_v6 = vadd.f32 %v2251_v1, %v2248_v3 }
 0x302   : > { %2253 = vst [vmem:[%s215_s25] sm:$0xff] %v2252_v6 }
 0x303   : > { %2833 = shalt.err (!%p2830_p3)
}
 0x304   : > { %s2834_s12 = scalar_lea.hbm %s2266_s7, 128  ;;  %s2838_s15 = scalar_lea.hbm %s3509_s5, 256 }
 0x305   : > { %p2835_p4 = scmp.ne.s32.totalorder %s2266_s7, %s2834_s12  ;;  %p2839_p9 = scmp.lt.s32.totalorder %s2266_s7, %s3509_s5 }
 0x306   : > { %p2840_p10 = scmp.lt.s32.totalorder %s2838_s15, %s2834_s12 }
 0x307   : > { %p2836_p7 = pnand %p2835_p4, %p2953_p5 }
 0x308   : > { %p2841_p11 = por %p2840_p10, %p2839_p9 }
 0x309   : > { %p2837_p8 = pneg %p2836_p7 }
 0x30b   : > { %p2842_p12 = pnand %p2841_p11, %p2837_p8 }
 0x30d   : > { %2845 = shalt.err (!%p2842_p12)
}
 0x30e   : > { %2775 = dma.vmem_to_hbm [thread:$0]  (%p2953_p5), %s2269_s26, 128, %s2266_s7, %s2255_s8  }
 0x30f PF: > { %p2781_p13 = scmp.ge.s32.totalorder %s2880_s21, 2  ;;  %s2280_s23 = sand.u32 1, %s2868_s18  }
 0x310   : > { %s2281_s25 = scalar_lea.sflag [#allocation3], %s2280_s23 }
 0x311   : > { %p2778_p0 = pnand %p2781_p13, %p2957_p6 }
 0x313   : > { %p2779_p1 = pneg %p2778_p0 }
 0x315   : > { %2863 = dma.done.wait (%p2779_p1), %s2281_s25, 128  }
 0x316   : > { %2865 = vsyncadd (%p2779_p1), %s2281_s25, 4294967168  ;;  %p15_p2 = scmp.ge.s32.totalorder %s2940_s24, 4   ;;  %s3518_s18 = smov %s2872_s19 }
 0x317   : > { %s3519_s19 = smov %s2876_s20  ;;  %s3520_s20 = smov %s2951_s27 }
 0x318   : > { %s3521_s21 = smov %s2940_s24  ;;  %17 = sbr.rel (!%p15_p2) target bundleno = 3 (0x3), region = 75 }
 0x31d   :  { %2286 = vsyncpa [#allocation3], 1 }
 0x31e   :  { %2288 = vsyncpa [#allocation3 + $0x1], 1 }

</bundles_post_ra>
